<compile_context>
chip_gen: v7x
topology: tpu7x:2x2x1
jax: 0.10.0
libtpu: 0.0.40
codegen_flags: <defaults>
</compile_context>

<pallas_src>
import functools
import math

import jax
import jax.numpy as jnp
from jax import lax
from jax.experimental import pallas as pl
from jax.experimental.pallas import tpu as pltpu

GN_GROUPS = 32
GN_EPS = 1e-5


def _vmem_limit_bytes():
    """Generation-aware VMEM budget with headroom (falls back to a safe 64 MiB)."""
    try:
        cap = int(pltpu.get_tpu_info().vmem_capacity_bytes)
        return min(int(cap * 0.8), 100 * 1024 * 1024)
    except Exception:
        return 64 * 1024 * 1024


def _pick_tile(s, cap):
    """Largest tile <= cap that divides s (multiple of 8), else the full axis."""
    if s <= cap:
        return s
    best = 0
    for t in range(8, cap + 1, 8):
        if s % t == 0:
            best = t
    return best if best else s


# ----------------------------------------------------------------------------
# Kernel A: streaming GroupNorm statistics -> per-image (scale, shift) pairs.
# grid = (N, n_s); S is the (arbitrary) accumulation axis.
# ----------------------------------------------------------------------------
def _gn_stats_kernel(x_ref, gamma_ref, beta_ref, gmask_ref, stats_ref, sums_sc,
                     *, inv_count):
    si = pl.program_id(1)

    @pl.when(si == 0)
    def _():
        sums_sc[...] = jnp.zeros_like(sums_sc)

    x = x_ref[0]                                       # (TS, C) f32, token-major
    s1 = jnp.sum(x, axis=0, keepdims=True)             # (1, C) per-channel sum
    s2 = jnp.sum(x * x, axis=0, keepdims=True)         # (1, C) per-channel sum of squares
    sums_sc[...] += jnp.concatenate([s1, s2], axis=0)  # (2, C) f32 accumulator

    @pl.when(si == pl.num_programs(1) - 1)
    def _():
        # Group-sum both stats with one tiny dot against the (hoisted) block-diagonal mask;
        # the result is already broadcast back to per-channel form.
        gsum = jnp.dot(sums_sc[...], gmask_ref[...],
                       preferred_element_type=jnp.float32)          # (2, C)
        mean = gsum[0:1] * inv_count                                 # (1, C)
        # TODO(synk): single-pass E[x^2]-E[x]^2 variance (f32); use a centered second pass if
        # inputs can have very large means.
        var = gsum[1:2] * inv_count - mean * mean
        inv_std = lax.rsqrt(var + GN_EPS)
        scale = inv_std * gamma_ref[...]                             # (1, C)
        shift = beta_ref[...] - mean * scale                         # (1, C)
        stats_ref[0] = jnp.concatenate([scale, shift], axis=0)       # (2, C)


# ----------------------------------------------------------------------------
# Kernel B: fused GN-apply + Q/K/V projection + flash attention + out-proj + residual.
# grid = (N, n_q, n_kv).  K/V for the whole image are projected during the qi == 0 pass
# and stay resident in VMEM scratch for all later q tiles.
# ----------------------------------------------------------------------------
def _fused_gn_attn_kernel(xq_ref, xkv_ref, stats_ref,
                          wq_ref, bq_ref, wk_ref, bk_ref, wv_ref, bv_ref,
                          wo_ref, bo_ref, o_ref,
                          q_sc, k_sc, v_sc, m_sc, l_sc, acc_sc, *, tk):
    qi = pl.program_id(1)
    ki = pl.program_id(2)

    stats = stats_ref[0]                               # (2, C) f32
    gn_scale = stats[0:1]                              # (1, C)
    gn_shift = stats[1:2]                              # (1, C)

    row0 = pl.multiple_of(ki * tk, tk)                 # sublane-aligned scratch offset

    # ---- Fill the resident K/V VMEM cache once per image (first q-tile pass) ----
    @pl.when(qi == 0)
    def _():
        ykv = (xkv_ref[0] * gn_scale + gn_shift).astype(jnp.bfloat16)        # (tk, C)
        k = jnp.dot(ykv, wk_ref[...], preferred_element_type=jnp.float32) + bk_ref[...]
        v = jnp.dot(ykv, wv_ref[...], preferred_element_type=jnp.float32) + bv_ref[...]
        k_sc[pl.ds(row0, tk), :] = k.astype(jnp.bfloat16)
        v_sc[pl.ds(row0, tk), :] = v.astype(jnp.bfloat16)

    # ---- Per-(image, q-tile) init: project Q and reset the online-softmax state ----
    @pl.when(ki == 0)
    def _():
        yq = (xq_ref[0] * gn_scale + gn_shift).astype(jnp.bfloat16)          # (tq, C)
        # 1/sqrt(C) is already folded into wq / bq by the wrapper.
        q = jnp.dot(yq, wq_ref[...], preferred_element_type=jnp.float32) + bq_ref[...]
        q_sc[...] = q.astype(jnp.bfloat16)
        m_sc[...] = jnp.full_like(m_sc, -jnp.inf)
        l_sc[...] = jnp.zeros_like(l_sc)
        acc_sc[...] = jnp.zeros_like(acc_sc)

    # ---- One online-softmax step against the resident K/V tile ----
    k_t = k_sc[pl.ds(row0, tk), :]                     # (tk, C) bf16
    v_t = v_sc[pl.ds(row0, tk), :]                     # (tk, C) bf16
    s = lax.dot_general(q_sc[...], k_t, (((1,), (1,)), ((), ())),
                        preferred_element_type=jnp.float32)                  # (tq, tk) f32
    m_prev = m_sc[...]                                 # (tq, 1) f32
    m_new = jnp.maximum(m_prev, jnp.max(s, axis=-1, keepdims=True))
    alpha = jnp.exp(m_prev - m_new)
    p = jnp.exp(s - m_new)                             # (tq, tk) f32
    l_sc[...] = alpha * l_sc[...] + jnp.sum(p, axis=-1, keepdims=True)
    acc_sc[...] = alpha * acc_sc[...] + jnp.dot(p.astype(jnp.bfloat16), v_t,
                                                preferred_element_type=jnp.float32)
    m_sc[...] = m_new

    # ---- Finalize: normalize, out-projection, fused residual ----
    @pl.when(ki == pl.num_programs(2) - 1)
    def _():
        attn = acc_sc[...] * pl.reciprocal(l_sc[...], approx=True)           # (tq, C) f32
        out = jnp.dot(attn.astype(jnp.bfloat16), wo_ref[...],
                      preferred_element_type=jnp.float32) + bo_ref[...]
        o_ref[0] = (out + xq_ref[0]).astype(o_ref.dtype)                     # residual = q x-tile


@jax.jit
def attention_block_pallas(x, gamma, beta, w_in, b_in, w_out, b_out):
    """x: (N, C, H, W) float32.  Returns (N, C, H, W) float32."""
    N, C, H, W = x.shape
    S = H * W
    assert C % GN_GROUPS == 0, "GroupNorm(32, C) requires C % 32 == 0"
    cpg = C // GN_GROUPS

    xf = x.astype(jnp.float32)
    # Token-major layout once, in the wrapper (the module semantically does this transpose).
    # TODO(synk): a channel-major kernel variant would save this extra HBM read+write of x.
    x_sc = jnp.transpose(xf.reshape(N, C, S), (0, 2, 1))                     # (N, S, C)

    gamma2 = gamma.reshape(1, C).astype(jnp.float32)
    beta2 = beta.reshape(1, C).astype(jnp.float32)
    # Block-diagonal group mask, hoisted out of the kernel (DMA'd once, stays resident).
    gids = jnp.arange(C, dtype=jnp.int32) // cpg
    gmask = (gids[:, None] == gids[None, :]).astype(jnp.float32)             # (C, C)

    # Softmax 1/sqrt(d_head) folded into W_q / b_q (single head -> d_head == C).
    sm_scale = 1.0 / math.sqrt(C)
    wq = (w_in[:C, :].T * sm_scale).astype(jnp.bfloat16)                     # (C, C)
    bq = (b_in[:C] * sm_scale).reshape(1, C).astype(jnp.float32)
    wk = w_in[C:2 * C, :].T.astype(jnp.bfloat16)
    bk = b_in[C:2 * C].reshape(1, C).astype(jnp.float32)
    wv = w_in[2 * C:, :].T.astype(jnp.bfloat16)
    bv = b_in[2 * C:].reshape(1, C).astype(jnp.float32)
    wo = w_out.T.astype(jnp.bfloat16)                                        # (C, C)
    bo = b_out.reshape(1, C).astype(jnp.float32)

    vmem_limit = _vmem_limit_bytes()

    # ------------------- Kernel A: GroupNorm statistics (S tiled) -------------------
    ts = _pick_tile(S, 512)
    n_s = S // ts
    stats_cost = pl.CostEstimate(
        flops=int(N * (3 * S * C + 4 * C * C + 8 * C)),
        transcendentals=int(N * C),
        bytes_accessed=int(N * S * C * 4 + N * 2 * C * 4 + C * C * 4 + 4 * C * 4),
    )
    stats = pl.pallas_call(
        functools.partial(_gn_stats_kernel, inv_count=1.0 / float(cpg * S)),
        out_shape=jax.ShapeDtypeStruct((N, 2, C), jnp.float32),
        grid_spec=pltpu.PrefetchScalarGridSpec(
            num_scalar_prefetch=0,
            grid=(N, n_s),
            in_specs=[
                pl.BlockSpec((1, ts, C), lambda n, si: (n, si, 0)),   # x tile (token-major)
                pl.BlockSpec((1, C), lambda n, si: (0, 0)),           # gamma
                pl.BlockSpec((1, C), lambda n, si: (0, 0)),           # beta
                pl.BlockSpec((C, C), lambda n, si: (0, 0)),           # group mask (hoisted)
            ],
            out_specs=pl.BlockSpec((1, 2, C), lambda n, si: (n, 0, 0)),
            scratch_shapes=[pltpu.VMEM((2, C), jnp.float32)],
        ),
        compiler_params=pltpu.CompilerParams(
            dimension_semantics=("parallel", "arbitrary"),
            vmem_limit_bytes=vmem_limit),
        cost_estimate=stats_cost,
    )(x_sc, gamma2, beta2, gmask)

    # --------- Kernel B: fused GN-apply + QKV + flash attention + out-proj + residual ---------
    tq = _pick_tile(S, 512)
    tk = _pick_tile(S, 256)
    n_q = S // tq
    n_kv = S // tk

    attn_cost = pl.CostEstimate(
        flops=int(N * (4 * S * S * C + 8 * S * C * C + 8 * S * C)),
        transcendentals=int(N * (S * S + 2 * S)),
        bytes_accessed=int(3 * N * S * C * 4 + N * S * C * 4 + 4 * C * C * 2 + 4 * C * 4),
    )

    out_sc = pl.pallas_call(
        functools.partial(_fused_gn_attn_kernel, tk=tk),
        out_shape=jax.ShapeDtypeStruct((N, S, C), jnp.float32),
        grid_spec=pltpu.PrefetchScalarGridSpec(
            num_scalar_prefetch=0,
            grid=(N, n_q, n_kv),
            in_specs=[
                pl.BlockSpec((1, tq, C), lambda n, qi, ki: (n, qi, 0)),       # x q-tile / residual
                # kv x-tile: only needed while filling the resident K/V cache (qi == 0);
                # afterwards the index collapses to a constant block so its DMA is skipped.
                pl.BlockSpec((1, tk, C),
                             lambda n, qi, ki: (n, jnp.where(qi == 0, ki, 0), 0)),
                pl.BlockSpec((1, 2, C), lambda n, qi, ki: (n, 0, 0)),         # GN scale/shift
                pl.BlockSpec((C, C), lambda n, qi, ki: (0, 0)),               # W_q^T * 1/sqrt(C)
                pl.BlockSpec((1, C), lambda n, qi, ki: (0, 0)),               # b_q * 1/sqrt(C)
                pl.BlockSpec((C, C), lambda n, qi, ki: (0, 0)),               # W_k^T
                pl.BlockSpec((1, C), lambda n, qi, ki: (0, 0)),               # b_k
                pl.BlockSpec((C, C), lambda n, qi, ki: (0, 0)),               # W_v^T
                pl.BlockSpec((1, C), lambda n, qi, ki: (0, 0)),               # b_v
                pl.BlockSpec((C, C), lambda n, qi, ki: (0, 0)),               # W_out^T
                pl.BlockSpec((1, C), lambda n, qi, ki: (0, 0)),               # b_out
            ],
            out_specs=pl.BlockSpec((1, tq, C), lambda n, qi, ki: (n, qi, 0)),
            scratch_shapes=[
                pltpu.VMEM((tq, C), jnp.bfloat16),     # Q tile (resident per q-tile)
                pltpu.VMEM((S, C), jnp.bfloat16),      # full-image K (resident per image)
                pltpu.VMEM((S, C), jnp.bfloat16),      # full-image V (resident per image)
                pltpu.VMEM((tq, 1), jnp.float32),      # running max
                pltpu.VMEM((tq, 1), jnp.float32),      # running sum
                pltpu.VMEM((tq, C), jnp.float32),      # output accumulator
            ],
        ),
        compiler_params=pltpu.CompilerParams(
            # q and kv axes carry the resident K/V cache dependency -> "arbitrary".
            dimension_semantics=("parallel", "arbitrary", "arbitrary"),
            vmem_limit_bytes=vmem_limit),
        cost_estimate=attn_cost,
    )(x_sc, x_sc, stats, wq, bq, wk, bk, wv, bv, wo, bo)

    # Back to NCHW (one XLA transpose).
    return jnp.transpose(out_sc, (0, 2, 1)).reshape(N, C, H, W)


# ----------------------------------------------------------------------------
# Pure-JAX reference mirroring the PyTorch forward (f32 throughout).
# ----------------------------------------------------------------------------
def attention_block_reference(x, gamma, beta, w_in, b_in, w_out, b_out):
    N, C, H, W = x.shape
    HW = H * W
    cpg = C // GN_GROUPS
    xg = x.reshape(N, GN_GROUPS, cpg, HW)
    mean = xg.mean(axis=(2, 3), keepdims=True)
    var = xg.var(axis=(2, 3), keepdims=True)
    xn = (xg - mean) / jnp.sqrt(var + GN_EPS)
    xn = xn.reshape(N, C, HW) * gamma[None, :, None] + beta[None, :, None]
    xs = jnp.transpose(xn, (0, 2, 1))                       # (N, S, C)
    qkv = xs @ w_in.T + b_in
    q, k, v = jnp.split(qkv, 3, axis=-1)
    wgt = (q @ jnp.transpose(k, (0, 2, 1))) / math.sqrt(C)
    wgt = jax.nn.softmax(wgt, axis=-1)
    out = wgt @ v
    out = out @ w_out.T + b_out
    out = jnp.transpose(out, (0, 2, 1)).reshape(N, C, H, W)
    return out + x


if __name__ == "__main__":
    def run_case(N, C, H, W, case_idx):
        key = jax.random.fold_in(jax.random.PRNGKey(0), case_idx)
        kx, kw1, kb1, kw2, kb2, kg, kb = jax.random.split(key, 7)
        x = jax.random.normal(kx, (N, C, H, W), jnp.float32)
        gamma = 1.0 + 0.1 * jax.random.normal(kg, (C,), jnp.float32)
        beta = 0.1 * jax.random.normal(kb, (C,), jnp.float32)
        w_in = jax.random.normal(kw1, (3 * C, C), jnp.float32) / math.sqrt(C)
        b_in = 0.1 * jax.random.normal(kb1, (3 * C,), jnp.float32)
        w_out = jax.random.normal(kw2, (C, C), jnp.float32) / math.sqrt(C)
        b_out = 0.1 * jax.random.normal(kb2, (C,), jnp.float32)

        out = jax.block_until_ready(
            attention_block_pallas(x, gamma, beta, w_in, b_in, w_out, b_out))
        ref = attention_block_reference(x, gamma, beta, w_in, b_in, w_out, b_out)
        assert out.shape == (N, C, H, W)
        err = float(jnp.max(jnp.abs(out - ref)))
        # bf16 MXU operands with f32 accumulation / f32 stats -> small absolute error.
        assert jnp.allclose(out, ref, atol=3e-2, rtol=3e-2), err

    # Small case: single q/kv tile path (channels multiple of 32 for GroupNorm).
    run_case(2, 64, 8, 8, 0)
    # Larger case: S=1024, C=128 -> multi q-tile, multi kv-tile online-softmax path,
    # multi-tile GroupNorm statistics accumulation, resident-K/V reuse across q tiles.
    run_case(1, 128, 32, 32, 1)

    print("KERNEL_OK")
</pallas_src>

<mosaic_0001>
module attributes {stable_mosaic.version = 11 : i64} {
  func.func @_gn_stats_kernel(%arg0: i32, %arg1: i32, %arg2: memref<1x64x64xf32, #tpu.memory_space<vmem>>, %arg3: memref<1x64xf32, #tpu.memory_space<vmem>>, %arg4: memref<1x64xf32, #tpu.memory_space<vmem>>, %arg5: memref<64x64xf32, #tpu.memory_space<vmem>>, %arg6: memref<1x2x64xf32, #tpu.memory_space<vmem>>, %arg7: memref<2x64xf32, #tpu.memory_space<vmem>>) attributes {dimension_semantics = [#tpu.dimension_semantics<parallel>, #tpu.dimension_semantics<arbitrary>], iteration_bounds = array<i64: 2, 1>, scalar_prefetch = 0 : i64, scratch_operands = 1 : i64, tpu.core_type = #tpu.core_type<tc>, window_params = [{transform_indices = @transform_0, window_bounds = array<i64: 1, 64, 64>}, {pipeline_mode = #tpu.pipeline_mode<synchronous>, transform_indices = @transform_1, window_bounds = array<i64: 1, 64>}, {pipeline_mode = #tpu.pipeline_mode<synchronous>, transform_indices = @transform_2, window_bounds = array<i64: 1, 64>}, {pipeline_mode = #tpu.pipeline_mode<synchronous>, transform_indices = @transform_3, window_bounds = array<i64: 64, 64>}, {transform_indices = @transform_4, window_bounds = array<i64: 1, 2, 64>}]} {
    %c0_i32 = arith.constant 0 : i32
    %0 = arith.cmpi eq, %arg1, %c0_i32 : i32
    %1 = arith.extui %0 : i1 to i32
    %c0_i32_0 = arith.constant 0 : i32
    %2 = arith.cmpi ne, %1, %c0_i32_0 : i32
    scf.if %2 {
      %cst_10 = arith.constant 0.000000e+00 : f32
      %17 = vector.broadcast %cst_10 : f32 to vector<2x64xf32>
      %c0_11 = arith.constant 0 : index
      %c0_12 = arith.constant 0 : index
      %18 = vector.load %arg7[%c0_11, %c0_12] : memref<2x64xf32, #tpu.memory_space<vmem>>, vector<2x64xf32>
      tpu.vector_store %arg7[%c0_11, %c0_12], %17 {strides = array<i32>} : memref<2x64xf32, #tpu.memory_space<vmem>>, vector<2x64xf32>,
    } else {
    }
    %c0 = arith.constant 0 : index
    %c0_1 = arith.constant 0 : index
    %c0_2 = arith.constant 0 : index
    %3 = vector.load %arg2[%c0, %c0_1, %c0_2] : memref<1x64x64xf32, #tpu.memory_space<vmem>>, vector<1x64x64xf32>
    %4 = vector.shape_cast %3 : vector<1x64x64xf32> to vector<64x64xf32>
    %cst = arith.constant dense<0.000000e+00> : vector<64xf32>
    %5 = vector.multi_reduction <add>, %4, %cst [0] : vector<64x64xf32> to vector<64xf32>
    %6 = vector.shape_cast %5 : vector<64xf32> to vector<1x64xf32>
    %7 = arith.mulf %4, %4 : vector<64x64xf32>
    %cst_3 = arith.constant dense<0.000000e+00> : vector<64xf32>
    %8 = vector.multi_reduction <add>, %7, %cst_3 [0] : vector<64x64xf32> to vector<64xf32>
    %9 = vector.shape_cast %8 : vector<64xf32> to vector<1x64xf32>
    %c0_4 = arith.constant 0 : index
    %c0_5 = arith.constant 0 : index
    %10 = vector.load %arg7[%c0_4, %c0_5] : memref<2x64xf32, #tpu.memory_space<vmem>>, vector<2x64xf32>
    %11 = tpu.concatenate %6, %9 in 0 : vector<1x64xf32>, vector<1x64xf32> -> vector<2x64xf32>
    %12 = arith.addf %10, %11 : vector<2x64xf32>
    %c0_6 = arith.constant 0 : index
    %c0_7 = arith.constant 0 : index
    %13 = vector.load %arg7[%c0_6, %c0_7] : memref<2x64xf32, #tpu.memory_space<vmem>>, vector<2x64xf32>
    tpu.vector_store %arg7[%c0_6, %c0_7], %12 {strides = array<i32>} : memref<2x64xf32, #tpu.memory_space<vmem>>, vector<2x64xf32>,
    %c0_i32_8 = arith.constant 0 : i32
    %14 = arith.cmpi eq, %arg1, %c0_i32_8 : i32
    %15 = arith.extui %14 : i1 to i32
    %c0_i32_9 = arith.constant 0 : i32
    %16 = arith.cmpi ne, %15, %c0_i32_9 : i32
    scf.if %16 {
      %c0_10 = arith.constant 0 : index
      %c0_11 = arith.constant 0 : index
      %17 = vector.load %arg7[%c0_10, %c0_11] : memref<2x64xf32, #tpu.memory_space<vmem>>, vector<2x64xf32>
      %c0_12 = arith.constant 0 : index
      %c0_13 = arith.constant 0 : index
      %18 = vector.load %arg5[%c0_12, %c0_13] : memref<64x64xf32, #tpu.memory_space<vmem>>, vector<64x64xf32>
      %cst_14 = arith.constant dense<0.000000e+00> : vector<2x64xf32>
      %19 = tpu.matmul %17, %18, %cst_14 {dimension_numbers = #tpu.dot_dimension_numbers<[1], [0], [0], [1], [0, 0, 1, 1], [], []>} : vector<2x64xf32>, vector<64x64xf32>, vector<2x64xf32> -> vector<2x64xf32>
      %20 = vector.extract_strided_slice %19 {offsets = [0, 0], sizes = [1, 64], strides = [1, 1]} : vector<2x64xf32> to vector<1x64xf32>
      %cst_15 = arith.constant 7.812500e-03 : f32
      %21 = vector.broadcast %cst_15 : f32 to vector<1x64xf32>
      %22 = arith.mulf %20, %21 : vector<1x64xf32>
      %23 = vector.extract_strided_slice %19 {offsets = [1, 0], sizes = [1, 64], strides = [1, 1]} : vector<2x64xf32> to vector<1x64xf32>
      %cst_16 = arith.constant 7.812500e-03 : f32
      %24 = vector.broadcast %cst_16 : f32 to vector<1x64xf32>
      %25 = arith.mulf %23, %24 : vector<1x64xf32>
      %26 = arith.mulf %22, %22 : vector<1x64xf32>
      %27 = arith.subf %25, %26 : vector<1x64xf32>
      %cst_17 = arith.constant 9.99999974E-6 : f32
      %28 = vector.broadcast %cst_17 : f32 to vector<1x64xf32>
      %29 = arith.addf %27, %28 : vector<1x64xf32>
      %30 = math.rsqrt %29 : vector<1x64xf32>
      %c0_18 = arith.constant 0 : index
      %c0_19 = arith.constant 0 : index
      %31 = vector.load %arg3[%c0_18, %c0_19] : memref<1x64xf32, #tpu.memory_space<vmem>>, vector<1x64xf32>
      %32 = arith.mulf %30, %31 : vector<1x64xf32>
      %c0_20 = arith.constant 0 : index
      %c0_21 = arith.constant 0 : index
      %33 = vector.load %arg4[%c0_20, %c0_21] : memref<1x64xf32, #tpu.memory_space<vmem>>, vector<1x64xf32>
      %34 = arith.mulf %22, %32 : vector<1x64xf32>
      %35 = arith.subf %33, %34 : vector<1x64xf32>
      %36 = tpu.concatenate %32, %35 in 0 : vector<1x64xf32>, vector<1x64xf32> -> vector<2x64xf32>
      %c0_22 = arith.constant 0 : index
      %c0_23 = arith.constant 0 : index
      %c0_24 = arith.constant 0 : index
      %37 = vector.load %arg6[%c0_22, %c0_23, %c0_24] : memref<1x2x64xf32, #tpu.memory_space<vmem>>, vector<1x2x64xf32>
      %38 = vector.shape_cast %37 : vector<1x2x64xf32> to vector<2x64xf32>
      %39 = vector.shape_cast %36 : vector<2x64xf32> to vector<1x2x64xf32>
      tpu.vector_store %arg6[%c0_22, %c0_23, %c0_24], %39 {strides = array<i32>} : memref<1x2x64xf32, #tpu.memory_space<vmem>>, vector<1x2x64xf32>,
    } else {
    }
    return
  }
  func.func @transform_0(%arg0: i32, %arg1: i32) -> (i32, i32, i32) {
    %c0_i32 = arith.constant 0 : i32
    %c0_i32_0 = arith.constant 0 : i32
    return %arg0, %arg1, %c0_i32 : i32, i32, i32
  }
  func.func @transform_1(%arg0: i32, %arg1: i32) -> (i32, i32) {
    %c0_i32 = arith.constant 0 : i32
    %c0_i32_0 = arith.constant 0 : i32
    %c0_i32_1 = arith.constant 0 : i32
    return %c0_i32, %c0_i32_0 : i32, i32
  }
  func.func @transform_2(%arg0: i32, %arg1: i32) -> (i32, i32) {
    %c0_i32 = arith.constant 0 : i32
    %c0_i32_0 = arith.constant 0 : i32
    %c0_i32_1 = arith.constant 0 : i32
    return %c0_i32, %c0_i32_0 : i32, i32
  }
  func.func @transform_3(%arg0: i32, %arg1: i32) -> (i32, i32) {
    %c0_i32 = arith.constant 0 : i32
    %c0_i32_0 = arith.constant 0 : i32
    %c0_i32_1 = arith.constant 0 : i32
    return %c0_i32, %c0_i32_0 : i32, i32
  }
  func.func @transform_4(%arg0: i32, %arg1: i32) -> (i32, i32, i32) {
    %c0_i32 = arith.constant 0 : i32
    %c0_i32_0 = arith.constant 0 : i32
    %c0_i32_1 = arith.constant 0 : i32
    return %arg0, %c0_i32, %c0_i32_0 : i32, i32, i32
  }
}

module attributes {stable_mosaic.version = 11 : i64} {
  func.func @_fused_gn_attn_kernel(%arg0: i32, %arg1: i32, %arg2: i32, %arg3: memref<1x64x64xf32, #tpu.memory_space<vmem>>, %arg4: memref<1x64x64xf32, #tpu.memory_space<vmem>>, %arg5: memref<1x2x64xf32, #tpu.memory_space<vmem>>, %arg6: memref<64x64xbf16, #tpu.memory_space<vmem>>, %arg7: memref<1x64xf32, #tpu.memory_space<vmem>>, %arg8: memref<64x64xbf16, #tpu.memory_space<vmem>>, %arg9: memref<1x64xf32, #tpu.memory_space<vmem>>, %arg10: memref<64x64xbf16, #tpu.memory_space<vmem>>, %arg11: memref<1x64xf32, #tpu.memory_space<vmem>>, %arg12: memref<64x64xbf16, #tpu.memory_space<vmem>>, %arg13: memref<1x64xf32, #tpu.memory_space<vmem>>, %arg14: memref<1x64x64xf32, #tpu.memory_space<vmem>>, %arg15: memref<64x64xbf16, #tpu.memory_space<vmem>>, %arg16: memref<64x64xbf16, #tpu.memory_space<vmem>>, %arg17: memref<64x64xbf16, #tpu.memory_space<vmem>>, %arg18: memref<64x1xf32, #tpu.memory_space<vmem>>, %arg19: memref<64x1xf32, #tpu.memory_space<vmem>>, %arg20: memref<64x64xf32, #tpu.memory_space<vmem>>) attributes {dimension_semantics = [#tpu.dimension_semantics<parallel>, #tpu.dimension_semantics<arbitrary>, #tpu.dimension_semantics<arbitrary>], iteration_bounds = array<i64: 2, 1, 1>, scalar_prefetch = 0 : i64, scratch_operands = 6 : i64, tpu.core_type = #tpu.core_type<tc>, window_params = [{transform_indices = @transform_0, window_bounds = array<i64: 1, 64, 64>}, {transform_indices = @transform_1, window_bounds = array<i64: 1, 64, 64>}, {transform_indices = @transform_2, window_bounds = array<i64: 1, 2, 64>}, {pipeline_mode = #tpu.pipeline_mode<synchronous>, transform_indices = @transform_3, window_bounds = array<i64: 64, 64>}, {pipeline_mode = #tpu.pipeline_mode<synchronous>, transform_indices = @transform_4, window_bounds = array<i64: 1, 64>}, {pipeline_mode = #tpu.pipeline_mode<synchronous>, transform_indices = @transform_5, window_bounds = array<i64: 64, 64>}, {pipeline_mode = #tpu.pipeline_mode<synchronous>, transform_indices = @transform_6, window_bounds = array<i64: 1, 64>}, {pipeline_mode = #tpu.pipeline_mode<synchronous>, transform_indices = @transform_7, window_bounds = array<i64: 64, 64>}, {pipeline_mode = #tpu.pipeline_mode<synchronous>, transform_indices = @transform_8, window_bounds = array<i64: 1, 64>}, {pipeline_mode = #tpu.pipeline_mode<synchronous>, transform_indices = @transform_9, window_bounds = array<i64: 64, 64>}, {pipeline_mode = #tpu.pipeline_mode<synchronous>, transform_indices = @transform_10, window_bounds = array<i64: 1, 64>}, {transform_indices = @transform_11, window_bounds = array<i64: 1, 64, 64>}]} {
    %c0 = arith.constant 0 : index
    %c0_0 = arith.constant 0 : index
    %c0_1 = arith.constant 0 : index
    %0 = vector.load %arg5[%c0, %c0_0, %c0_1] : memref<1x2x64xf32, #tpu.memory_space<vmem>>, vector<1x2x64xf32>
    %1 = vector.shape_cast %0 : vector<1x2x64xf32> to vector<2x64xf32>
    %2 = vector.extract_strided_slice %1 {offsets = [0, 0], sizes = [1, 64], strides = [1, 1]} : vector<2x64xf32> to vector<1x64xf32>
    %3 = vector.extract_strided_slice %1 {offsets = [1, 0], sizes = [1, 64], strides = [1, 1]} : vector<2x64xf32> to vector<1x64xf32>
    %c64_i32 = arith.constant 64 : i32
    %4 = arith.muli %arg2, %c64_i32 : i32
    %5 = tpu.assume_multiple %4, 64 : i32
    %c0_i32 = arith.constant 0 : i32
    %6 = arith.cmpi eq, %arg1, %c0_i32 : i32
    %7 = arith.extui %6 : i1 to i32
    %c0_i32_2 = arith.constant 0 : i32
    %8 = arith.cmpi ne, %7, %c0_i32_2 : i32
    scf.if %8 {
      %c0_26 = arith.constant 0 : index
      %c0_27 = arith.constant 0 : index
      %c0_28 = arith.constant 0 : index
      %44 = vector.load %arg4[%c0_26, %c0_27, %c0_28] : memref<1x64x64xf32, #tpu.memory_space<vmem>>, vector<1x64x64xf32>
      %45 = vector.shape_cast %44 : vector<1x64x64xf32> to vector<64x64xf32>
      %46 = vector.broadcast %2 : vector<1x64xf32> to vector<64x64xf32>
      %47 = arith.mulf %45, %46 : vector<64x64xf32>
      %48 = vector.broadcast %3 : vector<1x64xf32> to vector<64x64xf32>
      %49 = arith.addf %47, %48 : vector<64x64xf32>
      %50 = arith.truncf %49 : vector<64x64xf32> to vector<64x64xbf16>
      %c0_29 = arith.constant 0 : index
      %c0_30 = arith.constant 0 : index
      %51 = vector.load %arg8[%c0_29, %c0_30] : memref<64x64xbf16, #tpu.memory_space<vmem>>, vector<64x64xbf16>
      %cst_31 = arith.constant dense<0.000000e+00> : vector<64x64xf32>
      %52 = tpu.matmul %50, %51, %cst_31 {dimension_numbers = #tpu.dot_dimension_numbers<[1], [0], [0], [1], [0, 0, 1, 1], [], []>} : vector<64x64xbf16>, vector<64x64xbf16>, vector<64x64xf32> -> vector<64x64xf32>
      %c0_32 = arith.constant 0 : index
      %c0_33 = arith.constant 0 : index
      %53 = vector.load %arg9[%c0_32, %c0_33] : memref<1x64xf32, #tpu.memory_space<vmem>>, vector<1x64xf32>
      %54 = vector.broadcast %53 : vector<1x64xf32> to vector<64x64xf32>
      %55 = arith.addf %52, %54 : vector<64x64xf32>
      %c0_34 = arith.constant 0 : index
      %c0_35 = arith.constant 0 : index
      %56 = vector.load %arg10[%c0_34, %c0_35] : memref<64x64xbf16, #tpu.memory_space<vmem>>, vector<64x64xbf16>
      %cst_36 = arith.constant dense<0.000000e+00> : vector<64x64xf32>
      %57 = tpu.matmul %50, %56, %cst_36 {dimension_numbers = #tpu.dot_dimension_numbers<[1], [0], [0], [1], [0, 0, 1, 1], [], []>} : vector<64x64xbf16>, vector<64x64xbf16>, vector<64x64xf32> -> vector<64x64xf32>
      %c0_37 = arith.constant 0 : index
      %c0_38 = arith.constant 0 : index
      %58 = vector.load %arg11[%c0_37, %c0_38] : memref<1x64xf32, #tpu.memory_space<vmem>>, vector<1x64xf32>
      %59 = vector.broadcast %58 : vector<1x64xf32> to vector<64x64xf32>
      %60 = arith.addf %57, %59 : vector<64x64xf32>
      %61 = arith.truncf %55 : vector<64x64xf32> to vector<64x64xbf16>
      %62 = arith.index_cast %5 : i32 to index
      %c0_39 = arith.constant 0 : index
      %63 = vector.load %arg16[%62, %c0_39] : memref<64x64xbf16, #tpu.memory_space<vmem>>, vector<64x64xbf16>
      tpu.vector_store %arg16[%62, %c0_39], %61 {strides = array<i32>} : memref<64x64xbf16, #tpu.memory_space<vmem>>, vector<64x64xbf16>,
      %64 = arith.truncf %60 : vector<64x64xf32> to vector<64x64xbf16>
      %65 = arith.index_cast %5 : i32 to index
      %c0_40 = arith.constant 0 : index
      %66 = vector.load %arg17[%65, %c0_40] : memref<64x64xbf16, #tpu.memory_space<vmem>>, vector<64x64xbf16>
      tpu.vector_store %arg17[%65, %c0_40], %64 {strides = array<i32>} : memref<64x64xbf16, #tpu.memory_space<vmem>>, vector<64x64xbf16>,
    } else {
    }
    %c0_i32_3 = arith.constant 0 : i32
    %9 = arith.cmpi eq, %arg2, %c0_i32_3 : i32
    %10 = arith.extui %9 : i1 to i32
    %c0_i32_4 = arith.constant 0 : i32
    %11 = arith.cmpi ne, %10, %c0_i32_4 : i32
    scf.if %11 {
      %c0_26 = arith.constant 0 : index
      %c0_27 = arith.constant 0 : index
      %c0_28 = arith.constant 0 : index
      %44 = vector.load %arg3[%c0_26, %c0_27, %c0_28] : memref<1x64x64xf32, #tpu.memory_space<vmem>>, vector<1x64x64xf32>
      %45 = vector.shape_cast %44 : vector<1x64x64xf32> to vector<64x64xf32>
      %46 = vector.broadcast %2 : vector<1x64xf32> to vector<64x64xf32>
      %47 = arith.mulf %45, %46 : vector<64x64xf32>
      %48 = vector.broadcast %3 : vector<1x64xf32> to vector<64x64xf32>
      %49 = arith.addf %47, %48 : vector<64x64xf32>
      %50 = arith.truncf %49 : vector<64x64xf32> to vector<64x64xbf16>
      %c0_29 = arith.constant 0 : index
      %c0_30 = arith.constant 0 : index
      %51 = vector.load %arg6[%c0_29, %c0_30] : memref<64x64xbf16, #tpu.memory_space<vmem>>, vector<64x64xbf16>
      %cst_31 = arith.constant dense<0.000000e+00> : vector<64x64xf32>
      %52 = tpu.matmul %50, %51, %cst_31 {dimension_numbers = #tpu.dot_dimension_numbers<[1], [0], [0], [1], [0, 0, 1, 1], [], []>} : vector<64x64xbf16>, vector<64x64xbf16>, vector<64x64xf32> -> vector<64x64xf32>
      %c0_32 = arith.constant 0 : index
      %c0_33 = arith.constant 0 : index
      %53 = vector.load %arg7[%c0_32, %c0_33] : memref<1x64xf32, #tpu.memory_space<vmem>>, vector<1x64xf32>
      %54 = vector.broadcast %53 : vector<1x64xf32> to vector<64x64xf32>
      %55 = arith.addf %52, %54 : vector<64x64xf32>
      %56 = arith.truncf %55 : vector<64x64xf32> to vector<64x64xbf16>
      %c0_34 = arith.constant 0 : index
      %c0_35 = arith.constant 0 : index
      %57 = vector.load %arg15[%c0_34, %c0_35] : memref<64x64xbf16, #tpu.memory_space<vmem>>, vector<64x64xbf16>
      tpu.vector_store %arg15[%c0_34, %c0_35], %56 {strides = array<i32>} : memref<64x64xbf16, #tpu.memory_space<vmem>>, vector<64x64xbf16>,
      %cst_36 = arith.constant 0xFF800000 : f32
      %58 = vector.broadcast %cst_36 : f32 to vector<64x1xf32>
      %c0_37 = arith.constant 0 : index
      %c0_38 = arith.constant 0 : index
      %59 = vector.load %arg18[%c0_37, %c0_38] : memref<64x1xf32, #tpu.memory_space<vmem>>, vector<64x1xf32>
      tpu.vector_store %arg18[%c0_37, %c0_38], %58 {strides = array<i32>} : memref<64x1xf32, #tpu.memory_space<vmem>>, vector<64x1xf32>,
      %cst_39 = arith.constant 0.000000e+00 : f32
      %60 = vector.broadcast %cst_39 : f32 to vector<64x1xf32>
      %c0_40 = arith.constant 0 : index
      %c0_41 = arith.constant 0 : index
      %61 = vector.load %arg19[%c0_40, %c0_41] : memref<64x1xf32, #tpu.memory_space<vmem>>, vector<64x1xf32>
      tpu.vector_store %arg19[%c0_40, %c0_41], %60 {strides = array<i32>} : memref<64x1xf32, #tpu.memory_space<vmem>>, vector<64x1xf32>,
      %cst_42 = arith.constant 0.000000e+00 : f32
      %62 = vector.broadcast %cst_42 : f32 to vector<64x64xf32>
      %c0_43 = arith.constant 0 : index
      %c0_44 = arith.constant 0 : index
      %63 = vector.load %arg20[%c0_43, %c0_44] : memref<64x64xf32, #tpu.memory_space<vmem>>, vector<64x64xf32>
      tpu.vector_store %arg20[%c0_43, %c0_44], %62 {strides = array<i32>} : memref<64x64xf32, #tpu.memory_space<vmem>>, vector<64x64xf32>,
    } else {
    }
    %12 = arith.index_cast %5 : i32 to index
    %c0_5 = arith.constant 0 : index
    %13 = vector.load %arg16[%12, %c0_5] : memref<64x64xbf16, #tpu.memory_space<vmem>>, vector<64x64xbf16>
    %14 = arith.index_cast %5 : i32 to index
    %c0_6 = arith.constant 0 : index
    %15 = vector.load %arg17[%14, %c0_6] : memref<64x64xbf16, #tpu.memory_space<vmem>>, vector<64x64xbf16>
    %c0_7 = arith.constant 0 : index
    %c0_8 = arith.constant 0 : index
    %16 = vector.load %arg15[%c0_7, %c0_8] : memref<64x64xbf16, #tpu.memory_space<vmem>>, vector<64x64xbf16>
    %cst = arith.constant dense<0.000000e+00> : vector<64x64xf32>
    %17 = tpu.matmul %16, %13, %cst {dimension_numbers = #tpu.dot_dimension_numbers<[1], [1], [0], [0], [0, 0, 1, 0], [], []>} : vector<64x64xbf16>, vector<64x64xbf16>, vector<64x64xf32> -> vector<64x64xf32>
    %c0_9 = arith.constant 0 : index
    %c0_10 = arith.constant 0 : index
    %18 = vector.load %arg18[%c0_9, %c0_10] : memref<64x1xf32, #tpu.memory_space<vmem>>, vector<64x1xf32>
    %cst_11 = arith.constant dense<0xFF800000> : vector<64xf32>
    %19 = vector.multi_reduction <maximumf>, %17, %cst_11 [1] : vector<64x64xf32> to vector<64xf32>
    %20 = vector.shape_cast %19 : vector<64xf32> to vector<64x1xf32>
    %21 = arith.maximumf %18, %20 : vector<64x1xf32>
    %22 = arith.subf %18, %21 : vector<64x1xf32>
    %23 = math.exp %22 : vector<64x1xf32>
    %24 = vector.broadcast %21 : vector<64x1xf32> to vector<64x64xf32>
    %25 = arith.subf %17, %24 : vector<64x64xf32>
    %26 = math.exp %25 : vector<64x64xf32>
    %c0_12 = arith.constant 0 : index
    %c0_13 = arith.constant 0 : index
    %27 = vector.load %arg19[%c0_12, %c0_13] : memref<64x1xf32, #tpu.memory_space<vmem>>, vector<64x1xf32>
    %28 = arith.mulf %23, %27 : vector<64x1xf32>
    %cst_14 = arith.constant dense<0.000000e+00> : vector<64xf32>
    %29 = vector.multi_reduction <add>, %26, %cst_14 [1] : vector<64x64xf32> to vector<64xf32>
    %30 = vector.shape_cast %29 : vector<64xf32> to vector<64x1xf32>
    %31 = arith.addf %28, %30 : vector<64x1xf32>
    %c0_15 = arith.constant 0 : index
    %c0_16 = arith.constant 0 : index
    %32 = vector.load %arg19[%c0_15, %c0_16] : memref<64x1xf32, #tpu.memory_space<vmem>>, vector<64x1xf32>
    tpu.vector_store %arg19[%c0_15, %c0_16], %31 {strides = array<i32>} : memref<64x1xf32, #tpu.memory_space<vmem>>, vector<64x1xf32>,
    %c0_17 = arith.constant 0 : index
    %c0_18 = arith.constant 0 : index
    %33 = vector.load %arg20[%c0_17, %c0_18] : memref<64x64xf32, #tpu.memory_space<vmem>>, vector<64x64xf32>
    %34 = vector.broadcast %23 : vector<64x1xf32> to vector<64x64xf32>
    %35 = arith.mulf %34, %33 : vector<64x64xf32>
    %36 = arith.truncf %26 : vector<64x64xf32> to vector<64x64xbf16>
    %cst_19 = arith.constant dense<0.000000e+00> : vector<64x64xf32>
    %37 = tpu.matmul %36, %15, %cst_19 {dimension_numbers = #tpu.dot_dimension_numbers<[1], [0], [0], [1], [0, 0, 1, 1], [], []>} : vector<64x64xbf16>, vector<64x64xbf16>, vector<64x64xf32> -> vector<64x64xf32>
    %38 = arith.addf %35, %37 : vector<64x64xf32>
    %c0_20 = arith.constant 0 : index
    %c0_21 = arith.constant 0 : index
    %39 = vector.load %arg20[%c0_20, %c0_21] : memref<64x64xf32, #tpu.memory_space<vmem>>, vector<64x64xf32>
    tpu.vector_store %arg20[%c0_20, %c0_21], %38 {strides = array<i32>} : memref<64x64xf32, #tpu.memory_space<vmem>>, vector<64x64xf32>,
    %c0_22 = arith.constant 0 : index
    %c0_23 = arith.constant 0 : index
    %40 = vector.load %arg18[%c0_22, %c0_23] : memref<64x1xf32, #tpu.memory_space<vmem>>, vector<64x1xf32>
    tpu.vector_store %arg18[%c0_22, %c0_23], %21 {strides = array<i32>} : memref<64x1xf32, #tpu.memory_space<vmem>>, vector<64x1xf32>,
    %c0_i32_24 = arith.constant 0 : i32
    %41 = arith.cmpi eq, %arg2, %c0_i32_24 : i32
    %42 = arith.extui %41 : i1 to i32
    %c0_i32_25 = arith.constant 0 : i32
    %43 = arith.cmpi ne, %42, %c0_i32_25 : i32
    scf.if %43 {
      %c0_26 = arith.constant 0 : index
      %c0_27 = arith.constant 0 : index
      %44 = vector.load %arg20[%c0_26, %c0_27] : memref<64x64xf32, #tpu.memory_space<vmem>>, vector<64x64xf32>
      %c0_28 = arith.constant 0 : index
      %c0_29 = arith.constant 0 : index
      %45 = vector.load %arg19[%c0_28, %c0_29] : memref<64x1xf32, #tpu.memory_space<vmem>>, vector<64x1xf32>
      %46 = tpu.reciprocal %45 {approx = true} : vector<64x1xf32> -> vector<64x1xf32>
      %47 = vector.broadcast %46 : vector<64x1xf32> to vector<64x64xf32>
      %48 = arith.mulf %44, %47 : vector<64x64xf32>
      %49 = arith.truncf %48 : vector<64x64xf32> to vector<64x64xbf16>
      %c0_30 = arith.constant 0 : index
      %c0_31 = arith.constant 0 : index
      %50 = vector.load %arg12[%c0_30, %c0_31] : memref<64x64xbf16, #tpu.memory_space<vmem>>, vector<64x64xbf16>
      %cst_32 = arith.constant dense<0.000000e+00> : vector<64x64xf32>
      %51 = tpu.matmul %49, %50, %cst_32 {dimension_numbers = #tpu.dot_dimension_numbers<[1], [0], [0], [1], [0, 0, 1, 1], [], []>} : vector<64x64xbf16>, vector<64x64xbf16>, vector<64x64xf32> -> vector<64x64xf32>
      %c0_33 = arith.constant 0 : index
      %c0_34 = arith.constant 0 : index
      %52 = vector.load %arg13[%c0_33, %c0_34] : memref<1x64xf32, #tpu.memory_space<vmem>>, vector<1x64xf32>
      %53 = vector.broadcast %52 : vector<1x64xf32> to vector<64x64xf32>
      %54 = arith.addf %51, %53 : vector<64x64xf32>
      %c0_35 = arith.constant 0 : index
      %c0_36 = arith.constant 0 : index
      %c0_37 = arith.constant 0 : index
      %55 = vector.load %arg3[%c0_35, %c0_36, %c0_37] : memref<1x64x64xf32, #tpu.memory_space<vmem>>, vector<1x64x64xf32>
      %56 = vector.shape_cast %55 : vector<1x64x64xf32> to vector<64x64xf32>
      %57 = arith.addf %54, %56 : vector<64x64xf32>
      %c0_38 = arith.constant 0 : index
      %c0_39 = arith.constant 0 : index
      %c0_40 = arith.constant 0 : index
      %58 = vector.load %arg14[%c0_38, %c0_39, %c0_40] : memref<1x64x64xf32, #tpu.memory_space<vmem>>, vector<1x64x64xf32>
      %59 = vector.shape_cast %58 : vector<1x64x64xf32> to vector<64x64xf32>
      %60 = vector.shape_cast %57 : vector<64x64xf32> to vector<1x64x64xf32>
      tpu.vector_store %arg14[%c0_38, %c0_39, %c0_40], %60 {strides = array<i32>} : memref<1x64x64xf32, #tpu.memory_space<vmem>>, vector<1x64x64xf32>,
    } else {
    }
    return
  }
  func.func @transform_0(%arg0: i32, %arg1: i32, %arg2: i32) -> (i32, i32, i32) {
    %c0_i32 = arith.constant 0 : i32
    %c0_i32_0 = arith.constant 0 : i32
    return %arg0, %arg1, %c0_i32 : i32, i32, i32
  }
  func.func @transform_1(%arg0: i32, %arg1: i32, %arg2: i32) -> (i32, i32, i32) {
    %c0_i32 = arith.constant 0 : i32
    %0 = arith.cmpi eq, %arg1, %c0_i32 : i32
    %c0_i32_0 = arith.constant 0 : i32
    %1 = arith.select %0, %arg2, %c0_i32_0 : i32
    %c0_i32_1 = arith.constant 0 : i32
    %c0_i32_2 = arith.constant 0 : i32
    return %arg0, %1, %c0_i32_1 : i32, i32, i32
  }
  func.func @transform_2(%arg0: i32, %arg1: i32, %arg2: i32) -> (i32, i32, i32) {
    %c0_i32 = arith.constant 0 : i32
    %c0_i32_0 = arith.constant 0 : i32
    %c0_i32_1 = arith.constant 0 : i32
    return %arg0, %c0_i32, %c0_i32_0 : i32, i32, i32
  }
  func.func @transform_3(%arg0: i32, %arg1: i32, %arg2: i32) -> (i32, i32) {
    %c0_i32 = arith.constant 0 : i32
    %c0_i32_0 = arith.constant 0 : i32
    %c0_i32_1 = arith.constant 0 : i32
    return %c0_i32, %c0_i32_0 : i32, i32
  }
  func.func @transform_4(%arg0: i32, %arg1: i32, %arg2: i32) -> (i32, i32) {
    %c0_i32 = arith.constant 0 : i32
    %c0_i32_0 = arith.constant 0 : i32
    %c0_i32_1 = arith.constant 0 : i32
    return %c0_i32, %c0_i32_0 : i32, i32
  }
  func.func @transform_5(%arg0: i32, %arg1: i32, %arg2: i32) -> (i32, i32) {
    %c0_i32 = arith.constant 0 : i32
    %c0_i32_0 = arith.constant 0 : i32
    %c0_i32_1 = arith.constant 0 : i32
    return %c0_i32, %c0_i32_0 : i32, i32
  }
  func.func @transform_6(%arg0: i32, %arg1: i32, %arg2: i32) -> (i32, i32) {
    %c0_i32 = arith.constant 0 : i32
    %c0_i32_0 = arith.constant 0 : i32
    %c0_i32_1 = arith.constant 0 : i32
    return %c0_i32, %c0_i32_0 : i32, i32
  }
  func.func @transform_7(%arg0: i32, %arg1: i32, %arg2: i32) -> (i32, i32) {
    %c0_i32 = arith.constant 0 : i32
    %c0_i32_0 = arith.constant 0 : i32
    %c0_i32_1 = arith.constant 0 : i32
    return %c0_i32, %c0_i32_0 : i32, i32
  }
  func.func @transform_8(%arg0: i32, %arg1: i32, %arg2: i32) -> (i32, i32) {
    %c0_i32 = arith.constant 0 : i32
    %c0_i32_0 = arith.constant 0 : i32
    %c0_i32_1 = arith.constant 0 : i32
    return %c0_i32, %c0_i32_0 : i32, i32
  }
  func.func @transform_9(%arg0: i32, %arg1: i32, %arg2: i32) -> (i32, i32) {
    %c0_i32 = arith.constant 0 : i32
    %c0_i32_0 = arith.constant 0 : i32
    %c0_i32_1 = arith.constant 0 : i32
    return %c0_i32, %c0_i32_0 : i32, i32
  }
  func.func @transform_10(%arg0: i32, %arg1: i32, %arg2: i32) -> (i32, i32) {
    %c0_i32 = arith.constant 0 : i32
    %c0_i32_0 = arith.constant 0 : i32
    %c0_i32_1 = arith.constant 0 : i32
    return %c0_i32, %c0_i32_0 : i32, i32
  }
  func.func @transform_11(%arg0: i32, %arg1: i32, %arg2: i32) -> (i32, i32, i32) {
    %c0_i32 = arith.constant 0 : i32
    %c0_i32_0 = arith.constant 0 : i32
    return %arg0, %arg1, %c0_i32 : i32, i32, i32
  }
}

</mosaic_0001>

<bundles_post_ra>
// kernel: attention_block_pallas.2
= control target key start
LH: loop header
LB: loop body
LE: loop exit
PB: predicated region body
PF: predicated region fallthrough
CT: control target
= control target key end

     0   :  { %9 = vsyncpa [#allocation4], 0  ;;  %s1302_s0 = inlined_call_operand.hbm [shape: f32[2,64,64], index: 0, kind: input, shape index: {}]   ;;  %s1303_s1 = inlined_call_operand.hbm [shape: f32[1,64], index: 1, kind: input, shape index: {}]   ;;  %s1304_s2 = inlined_call_operand.hbm [shape: f32[1,64], index: 2, kind: input, shape index: {}]   ;;  %s1305_s3 = inlined_call_operand.hbm [shape: f32[64,64], index: 3, kind: input, shape index: {}]   ;;  %s1306_s4 = inlined_call_operand.hbm [shape: f32[2,2,64], index: 4, kind: output, shape index: {}]  }
   0x1   :  { %11 = vsyncpa [#allocation4 + $0x1], 0 }
   0x2   :  { %12 = vsyncpa [#allocation7], 0 }
   0x3   :  { %13 = vsyncpa [#allocation10], 0 }
   0x4   :  { %14 = vsyncpa [#allocation5], 0 }
   0x5   :  { %16 = vsyncpa [#allocation5 + $0x1], 0  ;;  %s987_s15 = smov 0   ;;  %s989_s16 = smov 0  }
   0x6   :  { %s991_s17 = smov 0   ;;  %s993_s18 = smov 0  }
   0x7   :  { %s995_s19 = smov 0   ;;  %s997_s20 = smov 0  }
   0x8 LB: > { %s583_s21 = sadd.s32 4294967295, %s950_s20   ;;  %s584_s22 = sadd.s32 4294967294, %s950_s20   ;;  %s950_s20 = sphi %s997_s20, %s22_s20   ;;  %s946_s19 = sphi %s995_s19, %s1330_s19   ;;  %s942_s18 = sphi %s993_s18, %s1329_s18   ;;  %s938_s17 = sphi %s991_s17, %s1328_s17   ;;  %s934_s16 = sphi %s989_s16, %s1327_s16   ;;  %s930_s15 = sphi %s987_s15, %s1326_s15  }
   0x9   : > { %p56_p0 = scmp.ne.s32.totalorder %s934_s16, %s930_s15  ;;  %p1021_p1 = scmp.eq.s32.totalorder %s583_s21, 0 }
   0xa   : > { %p1025_p2 = scmp.eq.s32.totalorder %s583_s21, 1  ;;  %p149_p3 = scmp.eq.s32.totalorder %s584_s22, 1 }
   0xb   : > { %s1311_s23 = scalar_select %p1021_p1, 1, 0 }
   0xc   : > { %s1312_s24 = scalar_select %p1025_p2, 1, 0 }
   0xd   : > { %p1031_p4 = por %p1021_p1, %p56_p0  ;;  %p585_p5 = scmp.ge.s32.totalorder %s950_s20, 1 }
   0xe   : > { %p1036_p6 = por %p149_p3, %p56_p0  ;;  %p156_p7 = scmp.lt.s32.totalorder %s950_s20, 3 }
   0xf   : > { %s1313_s25 = scalar_select %p1031_p4, 1, 0 }
  0x10   : > { %s1314_s26 = scalar_select %p1036_p6, 1, 0 }
  0x11   : > { %p1041_p8 = pnand %p585_p5, %p156_p7  ;;  %s952_s28 = smov [#allocation6]  }
  0x12   : > { %s169_s29 = sshll.u32 %s952_s28, 4  ;;  %s953_s30 = smov [#allocation8]   ;;  %s170_s29 = int_to_ptr.vmem [resolvable:$true] %s169_s29 }
  0x13   : > { %s1315_s27 = scalar_select %p1041_p8, 1, 0 }
  0x14   : > { %p662_p10 = pneg %p1041_p8  ;;  %s180_s5 = sshll.u32 %s953_s30, 4  ;;  %s1054_s5 = int_to_ptr.vmem [resolvable:$true] %s180_s5 }
  0x15   : > { %s954_s7 = smov [#allocation9]   ;;  %s746_s11 = scalar_lea.hbm %s1303_s1, 16 }
  0x16   : > { %p1050_p11 = pnand %p662_p10, %p1021_p1  ;;  %s190_s8 = sshll.u32 %s954_s7, 4  ;;  %s1056_s8 = int_to_ptr.vmem [resolvable:$true] %s190_s8 }
  0x17   : > { %p747_p12 = scmp.ne.s32.totalorder %s1303_s1, %s746_s11  ;;  %p753_p5 = scmp.lt.u32.totalorder %s746_s11, %s1303_s1 }
  0x18   : > { %p1066_p13 = pneg %p1050_p11 }
  0x1a   : > { %p749_p0 = pnand %p1066_p13, %p747_p12 }
  0x1c   : > { %p750_p3 = pneg %p749_p0 }
  0x1e   : > { %p755_p7 = pnand %p753_p5, %p750_p3 }
  0x20   : > { %758 = shalt.err (!%p755_p7)
}
  0x21   : > { %s759_s28 = scalar_lea.vmem %s170_s29, 16  ;;  %s766_s30 = scalar_lea.vmem %s170_s29, 32 }
  0x22   : > { %p760_p10 = scmp.ne.s32.totalorder %s170_s29, %s759_s28  ;;  %p767_p1 = scmp.lt.s32.totalorder %s170_s29, %s170_s29 }
  0x23   : > { %p768_p4 = scmp.lt.s32.totalorder %s766_s30, %s759_s28 }
  0x24   : > { %p762_p9 = pnand %p760_p10, %p1066_p13 }
  0x25   : > { %p769_p8 = por %p768_p4, %p767_p1 }
  0x26   : > { %p763_p6 = pneg %p762_p9 }
  0x28   : > { %p770_p2 = pnand %p769_p8, %p763_p6 }
  0x2a   : > { %773 = shalt.err (!%p770_p2)
}
  0x2b   : > { %665 = dma.hbm_to_vmem [thread:$0]  (!%p1050_p11), %s1303_s1, 16, %s170_s29, [#allocation7]  }
  0x2c   : > { %s774_s12 = scalar_lea.hbm %s1304_s2, 16 }
  0x2d   : > { %p775_p9 = scmp.ne.s32.totalorder %s1304_s2, %s774_s12  ;;  %p781_p2 = scmp.lt.u32.totalorder %s774_s12, %s1304_s2 }
  0x2f   : > { %p777_p12 = pnand %p775_p9, %p1066_p13 }
  0x31   : > { %p778_p1 = pneg %p777_p12 }
  0x33   : > { %p783_p4 = pnand %p781_p2, %p778_p1 }
  0x35   : > { %786 = shalt.err (!%p783_p4)
}
  0x36   : > { %s787_s29 = scalar_lea.vmem %s1054_s5, 16  ;;  %s794_s30 = scalar_lea.vmem %s1054_s5, 32 }
  0x37   : > { %p788_p6 = scmp.ne.s32.totalorder %s1054_s5, %s787_s29  ;;  %p795_p3 = scmp.lt.s32.totalorder %s1054_s5, %s1054_s5 }
  0x38   : > { %p796_p5 = scmp.lt.s32.totalorder %s794_s30, %s787_s29 }
  0x39   : > { %p790_p8 = pnand %p788_p6, %p1066_p13 }
  0x3a   : > { %p797_p7 = por %p796_p5, %p795_p3 }
  0x3b   : > { %p791_p0 = pneg %p790_p8 }
  0x3d   : > { %p798_p10 = pnand %p797_p7, %p791_p0 }
  0x3f   : > { %801 = shalt.err (!%p798_p10)
}
  0x40   : > { %668 = dma.hbm_to_vmem [thread:$0]  (!%p1050_p11), %s1304_s2, 16, %s1054_s5, [#allocation7]  }
  0x41   : > { %s802_s12 = scalar_lea.hbm %s1305_s3, 1024 }
  0x42   : > { %p803_p9 = scmp.ne.s32.totalorder %s1305_s3, %s802_s12  ;;  %p809_p2 = scmp.lt.u32.totalorder %s802_s12, %s1305_s3 }
  0x44   : > { %p805_p12 = pnand %p803_p9, %p1066_p13 }
  0x46   : > { %p806_p1 = pneg %p805_p12 }
  0x48   : > { %p811_p4 = pnand %p809_p2, %p806_p1 }
  0x4a   : > { %814 = shalt.err (!%p811_p4)
}
  0x4b   : > { %s815_s5 = scalar_lea.vmem %s1056_s8, 1024  ;;  %p823_p3 = scmp.lt.s32.totalorder %s1056_s8, %s1056_s8 }
  0x4c   : > { %p816_p6 = scmp.ne.s32.totalorder %s1056_s8, %s815_s5  ;;  %p824_p5 = scmp.lt.s32.totalorder %s815_s5, %s815_s5 }
  0x4e   : > { %p818_p8 = pnand %p816_p6, %p1066_p13  ;;  %p825_p7 = por %p824_p5, %p823_p3 }
  0x50   : > { %p819_p0 = pneg %p818_p8 }
  0x52   : > { %p826_p10 = pnand %p825_p7, %p819_p0 }
  0x54   : > { %829 = shalt.err (!%p826_p10)
}
  0x55   : > { %s955_s29 = smov 128   ;;  %s956_s14 = smov 8  }
  0x56   : > { %671 = dma.hbm_to_vmem [thread:$0]  (!%p1050_p11), %s1305_s3, 1024, %s1056_s8, [#allocation10], %s955_s29, %s955_s29, %s956_s14  }
  0x57   : > { %s43_s9 = sadd.s32 1, %s938_s17  ;;  %s34_s10 = sadd.s32 1, %s946_s19 }
  0x58   : > { %p50_p13 = scmp.ne.s32.totalorder %s938_s17, %s934_s16  ;;  %p36_p9 = scmp.ge.s32.totalorder %s34_s10, 2 }
  0x59   : > { %p51_p12 = scmp.eq.s32.totalorder %s950_s20, 0  ;;  %p1318_p1 = scmp.ne.s32.totalorder %s1312_s24, 0 }
  0x5a   : > { %p683_p4 = scmp.lt.s32.totalorder %s950_s20, 2  ;;  %s1332_s10 = smov (%p36_p9, %s34_s10), 0 }
  0x5b   : > { %p1139_p2 = por %p1318_p1, %p50_p13  ;;  %p52_p6 = por %p51_p12, %p50_p13 }
  0x5c   : > { %s204_s6 = sand.u32 1, %s938_s17   ;;  %s38_s12 = ssub.s32 %s946_s19, %s1332_s10 }
  0x5d   : > { %p41_p8 = scmp.eq.s32.totalorder %s38_s12, 0  ;;  %s590_s8 = sshll.u32 %s204_s6, 6 }
  0x5e   : > { %s605_s13 = sshll.u32 %s946_s19, 10  ;;  %s208_s5 = scalar_lea.vmem [#allocation3], %s590_s8 }
  0x5f   : > { %s1151_s21 = scalar_select %p41_p8, %s938_s17, %s43_s9  }
  0x60   : > { %s1156_s24 = scalar_lea.hbm %s1302_s0, %s605_s13  ;;  %s217_s30 = sshll.u32 %s208_s5, 4  ;;  %s1158_s30 = int_to_ptr.vmem [resolvable:$true] %s217_s30 }
  0x61   : > { %p1162_p11 = pnand %p683_p4, %p52_p6  ;;  %s1166_s9 = scalar_lea.sflag [#allocation4], %s204_s6 }
  0x62   : > { %s830_s12 = scalar_lea.hbm %s1156_s24, 1024  ;;  %s835_s22 = scalar_lea.hbm %s1302_s0, 2048 }
  0x63   : > { %p831_p0 = scmp.ne.s32.totalorder %s1156_s24, %s830_s12  ;;  %p832_p3 = pneg %p1162_p11 }
  0x64   : > { %p836_p10 = scmp.lt.u32.totalorder %s1156_s24, %s1302_s0  ;;  %p837_p13 = scmp.lt.u32.totalorder %s835_s22, %s830_s12 }
  0x65   : > { %p833_p5 = pnand %p832_p3, %p831_p0  ;;  %p839_p12 = scmp.lt.u32.totalorder %s830_s12, %s1156_s24 }
  0x66   : > { %p838_p9 = por %p837_p13, %p836_p10 }
  0x67   : > { %p834_p7 = pneg %p833_p5 }
  0x68   : > { %p840_p1 = por %p839_p12, %p838_p9 }
  0x6a   : > { %p841_p4 = pnand %p840_p1, %p834_p7 }
  0x6c   : > { %844 = shalt.err (!%p841_p4)
}
  0x6d   : > { %s845_s6 = scalar_lea.vmem %s1158_s30, 1024  ;;  %s957_s8 = smov [#allocation3]  }
  0x6e   : > { %p846_p6 = scmp.ne.s32.totalorder %s1158_s30, %s845_s6  ;;  %s850_s13 = sshll.u32 %s957_s8, 4  ;;  %s851_s13 = int_to_ptr.vmem [resolvable:$false] %s850_s13 }
  0x6f   : > { %s852_s28 = scalar_lea.vmem %s851_s13, 2048  ;;  %p853_p5 = scmp.lt.s32.totalorder %s1158_s30, %s851_s13 }
  0x70   : > { %p848_p8 = pnand %p846_p6, %p832_p3  ;;  %p854_p10 = scmp.lt.s32.totalorder %s852_s28, %s845_s6 }
  0x72   : > { %p849_p0 = pneg %p848_p8  ;;  %p855_p13 = por %p854_p10, %p853_p5 }
  0x74   : > { %p856_p9 = pnand %p855_p13, %p849_p0 }
  0x76   : > { %859 = shalt.err (!%p856_p9)
}
  0x77   : > { %675 = dma.hbm_to_vmem [thread:$0]  (!%p1162_p11), %s1156_s24, 1024, %s1158_s30, %s1166_s9, %s955_s29, %s955_s29, %s956_s14  }
  0x78   : > { %p1321_p3 = scmp.ne.s32.totalorder %s1315_s27, 0 }
  0x79   : > { %s1200_s12 = sand.u32 (!%p1321_p3), 1, %s934_s16   ;;  %p1322_p7 = scmp.ne.s32.totalorder (!%p1321_p3), %s1313_s25, 0 }
  0x7a   : > { %229 = sbr.rel (%p1321_p3) target bundleno = 437 (0x1b5), region = 36  ;;  %s594_s22 = sshll.u32 (!%p1321_p3), %s1200_s12, 6 }
  0x7b   : > { %s232_s5 = scalar_lea.sflag (!%p1321_p3), [#allocation4], %s1200_s12  ;;  %s1204_s6 = scalar_lea.vmem (!%p1321_p3), [#allocation3], %s594_s22 }
  0x81   : > { %913 = dma.done.wait (%p1322_p7), %s232_s5, 1024  }
  0x82   : > { %915 = vsyncadd (%p1322_p7), %s232_s5, 4294966272  ;;  %p1323_p11 = scmp.ne.s32.totalorder %s1311_s23, 0 }
  0x84   : > { %917 = dma.done.wait (%p1323_p11), [#allocation7], 32  }
  0x85   : > { %919 = vsyncadd (%p1323_p11), [#allocation7], 4294967264 }
  0x86   : > { %921 = dma.done.wait (%p1323_p11), [#allocation10], 1024  }
  0x87   : > { %923 = vsyncadd (%p1323_p11), [#allocation10], 4294966272  ;;  %vm277_vm0 = vcmask 517120   ;;  %v958_v0 = vmov 0.0|0.0   ;;  %v959_v1 = vmov 0.0   ;;  %vm960_vm1 = vmmov 0  }
  0x88   : > { %634 = vmatprep.subr.bf16.mxu0 %v958_v0  ;;  %278 = vst.msk [vmem:[#allocation2] sm:$0x3] %vm277_vm0, %v959_v1  ;;  %631 = vmatprep.mubr.msk.f32.mxu0 %vm960_vm1, %v959_v1  ;;  %v348_v2 = vld [vmem:[#allocation9] sm:$0xff]  ;;  %v349_v3 = vld [vmem:[#allocation9 + $0x8] sm:$0xff]  ;;  %v350_v4 = vld [vmem:[#allocation9 + $0x10] sm:$0xff]  ;;  %vm287_vm2 = vcmask 523264  }
  0x89   : > { %v635_v5 = vpack.c.bf16 %v349_v3, %v348_v2  ;;  %v351_v6 = vld [vmem:[#allocation9 + $0x18] sm:$0xff]  ;;  %v280_v9 = vld [vmem:[%s1204_s6 + $0x8] sm:$0xff]  ;;  %v281_v10 = vld [vmem:[%s1204_s6 + $0x10] sm:$0xff]  ;;  %vm339_vm3 = vcmask 1040384   ;;  %s598_s23 = sshll.u32 %s1200_s12, 1  ;;  %s602_s25 = sshll.u32 %s942_s18, 5 }
  0x8a   : > { %v279_v7 = vld [vmem:[%s1204_s6] sm:$0xff]  ;;  %v638_v8 = vpack.c.bf16 %v351_v6, %v350_v4  ;;  %v282_v11 = vld [vmem:[%s1204_s6 + $0x18] sm:$0xff]  ;;  %v353_v14 = vld [vmem:[#allocation9 + $0x28] sm:$0xff]  ;;  %v289_v15 = vsel %vm287_vm2, %v280_v9, 0.0  ;;  %v291_v16 = vsel %vm287_vm2, %v281_v10, 0.0  ;;  %v310_v18 = vmul.f32 %v280_v9, %v280_v9  ;;  %s271_s27 = scalar_lea.vmem [#allocation11], %s598_s23  ;;  %s1251_s30 = scalar_lea.hbm %s1306_s4, %s602_s25 }
  0x8b   : > { %636 = vmatpush3.bf16.msra.mxu0 %v635_v5  ;;  %v288_v12 = vsel %vm287_vm2, %v279_v7, 0.0  ;;  %v352_v13 = vld [vmem:[#allocation9 + $0x20] sm:$0xff]  ;;  %v309_v17 = vmul.f32 %v279_v7, %v279_v7  ;;  %v293_v21 = vsel %vm287_vm2, %v282_v11, 0.0  ;;  %v311_v22 = vmul.f32 %v281_v10, %v281_v10  ;;  %v354_v28 = vld [vmem:[#allocation9 + $0x30] sm:$0xff]  ;;  %v355_v29 = vld [vmem:[#allocation9 + $0x38] sm:$0xff]  ;;  %s473_s29 = sshll.u32 %s271_s27, 4  ;;  %s1253_s29 = int_to_ptr.vmem [resolvable:$true] %s473_s29 }
  0x8c   : > { %637 = vmatprep.subr.bf16.mxu0 %v958_v0  ;;  %v283_v19 = vld [vmem:[%s1204_s6 + $0x20] sm:$0xff]  ;;  %v290_v20 = vadd.f32 %v289_v15, %v288_v12  ;;  %v312_v23 = vmul.f32 %v282_v11, %v282_v11  ;;  %v641_v24 = vpack.c.bf16 %v353_v14, %v352_v13  ;;  %v284_v25 = vld [vmem:[%s1204_s6 + $0x28] sm:$0xff]  ;;  %v318_v32 = vsel %vm287_vm2, %v310_v18, 0.0  ;;  %v285_v34 = vld [vmem:[%s1204_s6 + $0x30] sm:$0xff]  ;;  %s460_s7 = scalar_lea.sflag [#allocation5], %s1200_s12  ;;  %s860_s9 = scalar_lea.vmem %s1253_s29, 32 }
  0x8d   : > { %v295_v27 = vsel %vm287_vm2, %v283_v19, 0.0  ;;  %v313_v30 = vmul.f32 %v283_v19, %v283_v19  ;;  %v317_v31 = vsel %vm287_vm2, %v309_v17, 0.0  ;;  %v320_v33 = vsel %vm287_vm2, %v311_v22, 0.0  ;;  %v286_v41 = vld [vmem:[%s1204_s6 + $0x38] sm:$0xff]  ;;  %p861_p12 = scmp.ne.s32.totalorder %s1253_s29, %s860_s9  ;;  %s961_s18 = smov [#allocation11]  }
  0x8e   : > { %v292_v26 = vadd.f32 %v291_v16, %v290_v20  ;;  %v319_v36 = vadd.f32 %v318_v32, %v317_v31  ;;  %v297_v37 = vsel %vm287_vm2, %v284_v25, 0.0  ;;  %v314_v38 = vmul.f32 %v284_v25, %v284_v25  ;;  %v600_v20 = vld [vmem:[#allocation6] ss:$0 sm:$0xff]  ;;  %v445_v25 = vld [vmem:[#allocation8] sm:$0x1]  ;;  %s864_s8 = sshll.u32 %s961_s18, 4  ;;  %s865_s8 = int_to_ptr.vmem [resolvable:$false] %s864_s8 }
  0x8f   : > { %639 = vmatpush3.bf16.msra.mxu0 %v638_v8  ;;  %v322_v39 = vsel %vm287_vm2, %v312_v23, 0.0  ;;  %v644_v40 = vpack.c.bf16 %v355_v29, %v354_v28  ;;  %v299_v44 = vsel %vm287_vm2, %v285_v34, 0.0  ;;  %v315_v45 = vmul.f32 %v285_v34, %v285_v34  ;;  %v338_v8 = vld [vmem:[#allocation2] sm:$0x3]  ;;  %p862_p1 = pnand %p861_p12, %p1139_p2  ;;  %s866_s13 = scalar_lea.vmem %s865_s8, 64 }
  0x90   : > { %640 = vmatprep.subr.bf16.mxu0 %v958_v0  ;;  %v294_v35 = vadd.f32 %v293_v21, %v292_v26  ;;  %v321_v43 = vadd.f32 %v320_v33, %v319_v36  ;;  %v324_v46 = vsel %vm287_vm2, %v313_v30, 0.0  ;;  %v301_v49 = vsel %vm287_vm2, %v286_v41, 0.0  ;;  %p867_p6 = scmp.lt.s32.totalorder %s1253_s29, %s865_s8  ;;  %p868_p8 = scmp.lt.s32.totalorder %s866_s13, %s860_s9 }
  0x91   : > { %v316_v50 = vmul.f32 %v286_v41, %v286_v41  ;;  %v326_v51 = vsel %vm287_vm2, %v314_v38, 0.0  ;;  %v328_v54 = vsel %vm287_vm2, %v315_v45, 0.0  ;;  %v452_v19 = vlaneseq  ;;  %p863_p4 = pneg %p862_p1 }
  0x92   : > { %v296_v42 = vadd.f32 %v295_v27, %v294_v35  ;;  %v323_v48 = vadd.f32 %v322_v39, %v321_v43  ;;  %p869_p0 = por %p868_p8, %p867_p6 }
  0x93   : > { %642 = vmatpush3.bf16.msra.mxu0 %v641_v24  ;;  %v330_v57 = vsel %vm287_vm2, %v316_v50, 0.0  ;;  %v453_v23 = vshrl.u32 %v452_v19, 7 }
  0x94   : > { %643 = vmatprep.subr.bf16.mxu0 %v958_v0  ;;  %v298_v47 = vadd.f32 %v297_v37, %v296_v42  ;;  %v325_v53 = vadd.f32 %v324_v46, %v323_v48  ;;  %p870_p5 = pnand %p869_p0, %p863_p4 }
  0x95   : > { %v454_v27 = vsub.s32 0, %v453_v23 }
  0x96   : > { %v300_v52 = vadd.f32 %v299_v44, %v298_v47  ;;  %v327_v56 = vadd.f32 %v326_v51, %v325_v53 }
  0x97   : > { %645 = vmatpush3.bf16.msra.mxu0 %v644_v40 }
  0x98   : > { %v302_v55 = vadd.f32 %v301_v49, %v300_v52  ;;  %v329_v59 = vadd.f32 %v328_v54, %v327_v56 }
  0x9a   : > { %v303_v58 = vrot.slane %v302_v55, 4  ;;  %v331_v61 = vadd.f32 %v330_v57, %v329_v59 }
  0x9c   : > { %v304_v60 = vadd.f32 %v303_v58, %v302_v55  ;;  %v332_v63 = vrot.slane %v331_v61, 4 }
  0x9e   : > { %v305_v62 = vrot.slane %v304_v60, 2  ;;  %v333_v1 = vadd.f32 %v332_v63, %v331_v61 }
  0xa0   : > { %v306_v0 = vadd.f32 %v305_v62, %v304_v60  ;;  %v334_v3 = vrot.slane %v333_v1, 2 }
  0xa2   : > { %v307_v2 = vrot.slane %v306_v0, 1  ;;  %v335_v4 = vadd.f32 %v334_v3, %v333_v1 }
  0xa4   : > { %v308_v5 = vadd.f32 %v307_v2, %v306_v0  ;;  %v336_v6 = vrot.slane %v335_v4, 1 }
  0xa6   : > { %v337_v7 = vadd.f32 %v336_v6, %v335_v4 }
  0xa8   : > { %v340_v9 = vsel %vm339_vm3, %v308_v5, %v337_v7 }
  0xa9   : > { %v341_v10 = vadd.f32 %v340_v9, %v338_v8 }
  0xab   : > { %343 = vst.msk [vmem:[#allocation2] sm:$0x3] %vm277_vm0, %v341_v10 }
  0xb2   : > { %v347_v11 = vld [vmem:[#allocation2] sm:$0x3] }
  0xb3   : > { %632 = vmatmul.mubr.msk.f32.vlgmr.msra.gmra.mrb[0].mxu0 %vm287_vm2, %v347_v11 }
 0x186   : > { %v425_v12 = vpop.f32.mrb[0].mxu0 }
 0x187   : > { %v429_v13 = vmul.f32 0.0078125, %v425_v12  ;;  %v633_v14 = vpop.f32.mrb[1].mxu0 }
 0x189   : > { %v430_v15 = vmul.f32 %v429_v13, %v429_v13 }
 0x18b   : > { %v432_v16 = vrot.slane %v430_v15, 7 }
 0x18d   : > { %v434_v17 = vsub.f32 %v429_v13, %v432_v16 }
 0x18f   : > { %v435_v18 = vadd.f32 1e-05, %v434_v17 }
 0x191   : > { %744 = vrsqrt.f32 %v435_v18 }
 0x19b   : > { %v745_v21 = vpop.eup %744 }
 0x19c   : > { %v444_v22 = vmul.f32 %v745_v21, %v600_v20 }
 0x19e   : > { %v447_v24 = vrot.slane %v444_v22, 1 }
 0x1a0   : > { %v449_v26 = vmul.f32 %v447_v24, %v429_v13 }
 0x1a2   : > { %v450_v28 = vsub.f32 %v445_v25, %v449_v26 }
 0x1a4   : > { %v455_v29 = vrot.slane %v450_v28, %v454_v27 }
 0x1a6   : > { %v457_v30 = vsel %vm339_vm3, %v447_v24, %v455_v29 }
 0x1a7   : > { %458 = vst.msk [vmem:[%s271_s27] sm:$0x3] %vm277_vm0, %v457_v30 }
 0x1a8   : > { %873 = shalt.err (!%p870_p5)
}
 0x1a9   : > { %s874_s28 = scalar_lea.hbm %s1251_s30, 32  ;;  %s878_s5 = scalar_lea.hbm %s1306_s4, 64 }
 0x1aa   : > { %p875_p10 = scmp.ne.s32.totalorder %s1251_s30, %s874_s28  ;;  %p879_p3 = scmp.lt.u32.totalorder %s1251_s30, %s1306_s4 }
 0x1ab   : > { %p880_p7 = scmp.lt.u32.totalorder %s878_s5, %s874_s28  ;;  %p882_p12 = scmp.lt.u32.totalorder %s874_s28, %s1251_s30 }
 0x1ac   : > { %p876_p13 = pnand %p875_p10, %p1139_p2 }
 0x1ad   : > { %p881_p11 = por %p880_p7, %p879_p3 }
 0x1ae   : > { %p877_p9 = pneg %p876_p13 }
 0x1af   : > { %p883_p1 = por %p882_p12, %p881_p11 }
 0x1b1   : > { %p884_p4 = pnand %p883_p1, %p877_p9 }
 0x1b3   : > { %887 = shalt.err (!%p884_p4)
}
 0x1b4   : > { %660 = dma.vmem_to_hbm [thread:$0]  (%p1139_p2), %s1253_s29, 32, %s1251_s30, %s460_s7  }
 0x1b5 PF: > { %s485_s25 = sand.u32 1, %s930_s15   ;;  %p1324_p6 = scmp.ne.s32.totalorder %s1314_s26, 0 }
 0x1b6   : > { %p1325_p8 = scmp.ge.s32.totalorder %s950_s20, 2  ;;  %s486_s27 = scalar_lea.sflag [#allocation5], %s485_s25 }
 0x1b8   : > { %p677_p0 = pnand %p1325_p8, %p1324_p6 }
 0x1ba   : > { %925 = dma.done.wait (!%p677_p0), %s486_s27, 32  }
 0x1bb   : > { %927 = vsyncadd (!%p677_p0), %s486_s27, 4294967264  ;;  %s22_s20 = sadd.s32 1, %s950_s20   ;;  %s1326_s15 = smov %s934_s16 }
 0x1bc   : > { %p19_p5 = scmp.ge.s32.totalorder %s22_s20, 4   ;;  %s1327_s16 = smov %s938_s17 }
 0x1bd   : > { %s1328_s17 = smov %s1151_s21  ;;  %s1329_s18 = smov %s946_s19 }
 0x1be   : > { %s1330_s19 = smov %s1332_s10  ;;  %21 = sbr.rel (!%p19_p5) target bundleno = 8 (0x8), region = 101 }
 0x1c5   :  { %491 = vsyncpa [#allocation4], 1 }
 0x1c6   :  { %493 = vsyncpa [#allocation4 + $0x1], 1 }
 0x1c7   :  { %494 = vsyncpa [#allocation7], 1 }
 0x1c8   :  { %495 = vsyncpa [#allocation10], 1 }
 0x1c9   :  { %496 = vsyncpa [#allocation5], 1 }
 0x1ca   :  { %498 = vsyncpa [#allocation5 + $0x1], 1 }

// kernel: attention_block_pallas.3
= control target key start
LH: loop header
LB: loop body
LE: loop exit
PB: predicated region body
PF: predicated region fallthrough
CT: control target
= control target key end

     0   :  { %s3762_s0 = inlined_call_operand.hbm [shape: f32[2,64,64], index: 0, kind: input, shape index: {}, may-alias: {0,1}]   ;;  %s3763_s1 = inlined_call_operand.hbm [shape: f32[2,64,64], index: 1, kind: input, shape index: {}, may-alias: {0,1}]   ;;  %s3764_s2 = inlined_call_operand.hbm [shape: f32[2,2,64], index: 2, kind: input, shape index: {}]   ;;  %s3765_s3 = inlined_call_operand.hbm [shape: bf16[64,64], index: 3, kind: input, shape index: {}]   ;;  %s3766_s4 = inlined_call_operand.hbm [shape: f32[1,64], index: 4, kind: input, shape index: {}]   ;;  %s3767_s5 = inlined_call_operand.hbm [shape: bf16[64,64], index: 5, kind: input, shape index: {}]   ;;  %s3768_s6 = inlined_call_operand.hbm [shape: f32[1,64], index: 6, kind: input, shape index: {}]   ;;  %s3769_s7 = inlined_call_operand.hbm [shape: bf16[64,64], index: 7, kind: input, shape index: {}]   ;;  %s3770_s8 = inlined_call_operand.hbm [shape: f32[1,64], index: 8, kind: input, shape index: {}]   ;;  %s3771_s9 = inlined_call_operand.hbm [shape: bf16[64,64], index: 9, kind: input, shape index: {}]   ;;  %s3772_s10 = inlined_call_operand.hbm [shape: f32[1,64], index: 10, kind: input, shape index: {}]   ;;  %s3773_s11 = inlined_call_operand.hbm [shape: f32[2,64,64], index: 11, kind: output, shape index: {}]  }
   0x1   :  { %3798 = sst [smem:[#allocation41_spill]] %s3762_s0 }
   0x2   :  { %3799 = sst [smem:[#allocation42_spill]] %s3763_s1 }
   0x3   :  { %3800 = sst [smem:[#allocation43_spill]] %s3764_s2 }
   0x4   :  { %3801 = sst [smem:[#allocation44_spill]] %s3765_s3 }
   0x5   :  { %3802 = sst [smem:[#allocation45_spill]] %s3766_s4 }
   0x6   :  { %3803 = sst [smem:[#allocation46_spill]] %s3767_s5 }
   0x7   :  { %3804 = sst [smem:[#allocation47_spill]] %s3769_s7 }
   0x8   :  { %3805 = sst [smem:[#allocation48_spill]] %s3771_s9 }
   0x9   :  { %3806 = sst [smem:[#allocation49_spill]] %s3773_s11 }
   0xa   :  { %16 = vsyncpa [#allocation9], 0 }
   0xb   :  { %18 = vsyncpa [#allocation9 + $0x1], 0 }
   0xc   :  { %19 = vsyncpa [#allocation12], 0 }
   0xd   :  { %21 = vsyncpa [#allocation12 + $0x1], 0 }
   0xe   :  { %22 = vsyncpa [#allocation15], 0 }
   0xf   :  { %23 = vsyncpa [#allocation18], 0 }
  0x10   :  { %24 = vsyncpa [#allocation21], 0 }
  0x11   :  { %25 = vsyncpa [#allocation24], 0 }
  0x12   :  { %26 = vsyncpa [#allocation10], 0 }
  0x13   :  { %28 = vsyncpa [#allocation10 + $0x1], 0  ;;  %s2980_s17 = smov 0   ;;  %s2982_s18 = smov 0  }
  0x14   :  { %s2984_s19 = smov 0   ;;  %s2986_s20 = smov 0  }
  0x15   :  { %s2988_s21 = smov 0   ;;  %s2990_s22 = smov 0  }
  0x16 LB: > { %3807 = sst [smem:[#allocation34_spill]] %s2885_s19  ;;  %s3011_s23 = sadd.s32 4294967295, %s2897_s22   ;;  %s2897_s22 = sphi %s2990_s22, %s34_s22   ;;  %s2893_s21 = sphi %s2988_s21, %s3863_s21   ;;  %s2889_s20 = sphi %s2986_s20, %s3862_s20   ;;  %s2885_s19 = sphi %s2984_s19, %s3858_s19   ;;  %s2881_s18 = sphi %s2982_s18, %s3861_s18   ;;  %s2877_s17 = sphi %s2980_s17, %s3860_s17  }
  0x17   : > { %3808 = sst [smem:[#allocation35_spill]] %s2889_s20  ;;  %p2014_p0 = scmp.ge.s32.totalorder %s2897_s22, 1 }
  0x18   : > { %3809 = sst [smem:[#allocation36_spill]] %s2897_s22  ;;  %p3778_p1 = scmp.eq.s32.totalorder %s3011_s23, 0 }
  0x19   : > { %p340_p2 = scmp.lt.s32.totalorder %s2897_s22, 3  ;;  %s2899_s25 = smov [#allocation14]  }
  0x1a   : > { %s352_s26 = sshll.u32 %s2899_s25, 4  ;;  %s2900_s28 = smov [#allocation17]   ;;  %s3020_s26 = int_to_ptr.vmem [resolvable:$true] %s352_s26 }
  0x1b   : > { %p3016_p3 = pnand %p2014_p0, %p340_p2  ;;  %s376_s29 = sshll.u32 %s2900_s28, 4  ;;  %s3031_s29 = int_to_ptr.vmem [resolvable:$true] %s376_s29 }
  0x1c   : > { %s2901_s30 = smov [#allocation20]   ;;  %s3813_s3 = sld [smem:[#allocation44_spill]] }
  0x1d   : > { %s3810_s24 = scalar_select %p3016_p3, 1, 0 }
  0x1e   : > { %p2293_p4 = pneg %p3016_p3  ;;  %s3033_s12 = sshll.u32 %s2901_s30, 4  ;;  %s401_s12 = int_to_ptr.vmem [resolvable:$true] %s3033_s12 }
  0x1f   : > { %3811 = sst [smem:[#allocation37_spill]] %s3810_s24 }
  0x20   : > { %p3027_p6 = pnand %p2293_p4, %p3778_p1 }
  0x22   : > { %s3812_s27 = scalar_select %p3027_p6, 1, 0 }
  0x23   : > { %s2481_s15 = scalar_lea.hbm %s3813_s3, 512  ;;  %p3043_p8 = pneg %p3027_p6 }
  0x24   : > { %p2482_p7 = scmp.ne.s32.totalorder %s3813_s3, %s2481_s15  ;;  %p2488_p11 = scmp.lt.u32.totalorder %s2481_s15, %s3813_s3 }
  0x25   : > { %s3814_s11 = scalar_select %p3043_p8, 1, 0 }
  0x26   : > { %p2484_p9 = pnand %p3043_p8, %p2482_p7 }
  0x28   : > { %p2485_p10 = pneg %p2484_p9 }
  0x2a   : > { %p2490_p12 = pnand %p2488_p11, %p2485_p10 }
  0x2c   : > { %2493 = shalt.err (!%p2490_p12)
}
  0x2d   : > { %s2494_s13 = scalar_lea.vmem %s3020_s26, 512  ;;  %p2502_p4 = scmp.lt.s32.totalorder %s3020_s26, %s3020_s26 }
  0x2e   : > { %p2495_p13 = scmp.ne.s32.totalorder %s3020_s26, %s2494_s13  ;;  %p2503_p5 = scmp.lt.s32.totalorder %s2494_s13, %s2494_s13 }
  0x30   : > { %p2497_p0 = pnand %p2495_p13, %p3043_p8  ;;  %p2504_p7 = por %p2503_p5, %p2502_p4 }
  0x32   : > { %p2498_p2 = pneg %p2497_p0 }
  0x34   : > { %p2505_p9 = pnand %p2504_p7, %p2498_p2 }
  0x36   : > { %2508 = shalt.err (!%p2505_p9)
}
  0x37   : > { %s2902_s14 = smov 64   ;;  %s2903_s15 = smov 4  }
  0x38   : > { %2296 = dma.hbm_to_vmem [thread:$0]  (!%p3027_p6), %s3813_s3, 512, %s3020_s26, [#allocation15], %s2902_s14, %s2902_s14, %s2903_s15  }
  0x39   : > { %s3815_s5 = sld [smem:[#allocation46_spill]] }
  0x3f   : > { %s2509_s13 = scalar_lea.hbm %s3815_s5, 512 }
  0x40   : > { %p2510_p5 = scmp.ne.s32.totalorder %s3815_s5, %s2509_s13  ;;  %p2516_p12 = scmp.lt.u32.totalorder %s2509_s13, %s3815_s5 }
  0x42   : > { %p2512_p10 = pnand %p2510_p5, %p3043_p8 }
  0x44   : > { %p2513_p11 = pneg %p2512_p10 }
  0x46   : > { %p2518_p13 = pnand %p2516_p12, %p2513_p11 }
  0x48   : > { %2521 = shalt.err (!%p2518_p13)
}
  0x49   : > { %s2522_s26 = scalar_lea.vmem %s3031_s29, 512  ;;  %p2530_p7 = scmp.lt.s32.totalorder %s3031_s29, %s3031_s29 }
  0x4a   : > { %p2523_p0 = scmp.ne.s32.totalorder %s3031_s29, %s2522_s26  ;;  %p2531_p9 = scmp.lt.s32.totalorder %s2522_s26, %s2522_s26 }
  0x4c   : > { %p2525_p2 = pnand %p2523_p0, %p3043_p8  ;;  %p2532_p5 = por %p2531_p9, %p2530_p7 }
  0x4e   : > { %p2526_p4 = pneg %p2525_p2 }
  0x50   : > { %p2533_p10 = pnand %p2532_p5, %p2526_p4 }
  0x52   : > { %2536 = shalt.err (!%p2533_p10)
}
  0x53   : > { %2302 = dma.hbm_to_vmem [thread:$0]  (!%p3027_p6), %s3815_s5, 512, %s3031_s29, [#allocation18], %s2902_s14, %s2902_s14, %s2903_s15  }
  0x54   : > { %s3816_s7 = sld [smem:[#allocation47_spill]] }
  0x5a   : > { %s2537_s16 = scalar_lea.hbm %s3816_s7, 512 }
  0x5b   : > { %p2538_p11 = scmp.ne.s32.totalorder %s3816_s7, %s2537_s16  ;;  %p2544_p0 = scmp.lt.u32.totalorder %s2537_s16, %s3816_s7 }
  0x5d   : > { %p2540_p12 = pnand %p2538_p11, %p3043_p8 }
  0x5f   : > { %p2541_p13 = pneg %p2540_p12 }
  0x61   : > { %p2546_p2 = pnand %p2544_p0, %p2541_p13 }
  0x63   : > { %2549 = shalt.err (!%p2546_p2)
}
  0x64   : > { %s2550_s26 = scalar_lea.vmem %s401_s12, 512  ;;  %p2558_p5 = scmp.lt.s32.totalorder %s401_s12, %s401_s12 }
  0x65   : > { %p2551_p4 = scmp.ne.s32.totalorder %s401_s12, %s2550_s26  ;;  %p2559_p10 = scmp.lt.s32.totalorder %s2550_s26, %s2550_s26 }
  0x67   : > { %p2553_p7 = pnand %p2551_p4, %p3043_p8  ;;  %p2560_p1 = por %p2559_p10, %p2558_p5 }
  0x69   : > { %p2554_p9 = pneg %p2553_p7 }
  0x6b   : > { %p2561_p3 = pnand %p2560_p1, %p2554_p9 }
  0x6d   : > { %2564 = shalt.err (!%p2561_p3)
}
  0x6e   : > { %2308 = dma.hbm_to_vmem [thread:$0]  (!%p3027_p6), %s3816_s7, 512, %s401_s12, [#allocation21], %s2902_s14, %s2902_s14, %s2903_s15  }
  0x6f   : > { %s2904_s2 = smov [#allocation23]   ;;  %s3817_s9 = sld [smem:[#allocation48_spill]] }
  0x70   : > { %s424_s20 = sshll.u32 %s2904_s2, 4  ;;  %s425_s20 = int_to_ptr.vmem [resolvable:$true] %s424_s20 }
  0x75   : > { %s2565_s25 = scalar_lea.hbm %s3817_s9, 512 }
  0x76   : > { %p2566_p1 = scmp.ne.s32.totalorder %s3817_s9, %s2565_s25  ;;  %p2572_p12 = scmp.lt.u32.totalorder %s2565_s25, %s3817_s9 }
  0x78   : > { %p2568_p3 = pnand %p2566_p1, %p3043_p8 }
  0x7a   : > { %p2569_p11 = pneg %p2568_p3 }
  0x7c   : > { %p2574_p13 = pnand %p2572_p12, %p2569_p11 }
  0x7e   : > { %2577 = shalt.err (!%p2574_p13)
}
  0x7f   : > { %s2578_s12 = scalar_lea.vmem %s425_s20, 512  ;;  %p2586_p7 = scmp.lt.s32.totalorder %s425_s20, %s425_s20 }
  0x80   : > { %p2579_p0 = scmp.ne.s32.totalorder %s425_s20, %s2578_s12  ;;  %p2587_p9 = scmp.lt.s32.totalorder %s2578_s12, %s2578_s12 }
  0x82   : > { %p2581_p2 = pnand %p2579_p0, %p3043_p8  ;;  %p2588_p5 = por %p2587_p9, %p2586_p7 }
  0x84   : > { %p2582_p4 = pneg %p2581_p2 }
  0x86   : > { %p2589_p10 = pnand %p2588_p5, %p2582_p4 }
  0x88   : > { %2592 = shalt.err (!%p2589_p10)
}
  0x89   : > { %2314 = dma.hbm_to_vmem [thread:$0]  (!%p3027_p6), %s3817_s9, 512, %s425_s20, [#allocation24], %s2902_s14, %s2902_s14, %s2903_s15  }
  0x8a   : > { %s2013_s2 = sadd.s32 4294967294, %s2897_s22   ;;  %s53_s24 = sadd.s32 1, %s2893_s21 }
  0x8b   : > { %p55_p1 = scmp.ge.s32.totalorder %s53_s24, 2  ;;  %s62_s16 = sadd.s32 1, %s2885_s19 }
  0x8c   : > { %p69_p3 = scmp.ne.s32.totalorder %s2885_s19, %s2881_s18  ;;  %p70_p11 = scmp.eq.s32.totalorder %s2897_s22, 0 }
  0x8d   : > { %s3865_s24 = smov (%p55_p1, %s53_s24), 0  ;;  %p75_p13 = scmp.ne.s32.totalorder %s2881_s18, %s2877_s17 }
  0x8e   : > { %3818 = sst [smem:[#allocation38_spill]] %s3865_s24  ;;  %p3144_p12 = por %p70_p11, %p69_p3 }
  0x8f   : > { %s57_s14 = ssub.s32 %s2893_s21, %s3865_s24  ;;  %p327_p0 = scmp.eq.s32.totalorder %s3011_s23, 1 }
  0x90   : > { %p60_p2 = scmp.eq.s32.totalorder %s57_s14, 0  ;;  %p3820_p4 = scmp.eq.s32.totalorder %s3011_s23, 0 }
  0x91   : > { %p3159_p9 = por %p327_p0, %p69_p3  ;;  %p333_p5 = scmp.eq.s32.totalorder %s2013_s2, 1 }
  0x92   : > { %p3155_p7 = por %p3820_p4, %p75_p13  ;;  %p2340_p1 = scmp.lt.s32.totalorder %s2897_s22, 2 }
  0x93   : > { %s3822_s20 = scalar_select %p3159_p9, 1, 0 }
  0x94   : > { %s3821_s15 = scalar_select %p3155_p7, 1, 0 }
  0x95   : > { %s3164_s28 = scalar_select %p60_p2, %s2885_s19, %s62_s16  }
  0x96   : > { %p3166_p10 = por %p333_p5, %p75_p13  ;;  %s3172_s13 = sand.u32 1, %s2885_s19  }
  0x97   : > { %3823 = sst [smem:[#allocation39_spill]] %s3164_s28  ;;  %s3781_s26 = sshll.u32 %s2893_s21, 10 }
  0x98   : > { %s3824_s30 = scalar_select %p3166_p10, 1, 0 }
  0x99   : > { %s3780_s12 = sshll.u32 %s3172_s13, 6  ;;  %p3178_p11 = pnand %p2340_p1, %p3144_p12 }
  0x9a   : > { %3825 = sst [smem:[#allocation40_spill]] %s3824_s30  ;;  %s472_s0 = sand.u32 1, %s2897_s22  }
  0x9b   : > { %s3826_s29 = scalar_select %p3178_p11, 1, 0 }
  0x9c   : > { %s3827_s1 = sld [smem:[#allocation42_spill]]  ;;  %s476_s3 = scalar_lea.vmem [#allocation11], %s3780_s12 }
  0x9d   : > { %s487_s5 = sshll.u32 %s476_s3, 4  ;;  %s3194_s25 = scalar_lea.sflag [#allocation12], %s472_s0  ;;  %s3192_s5 = int_to_ptr.vmem [resolvable:$true] %s487_s5 }
  0x9e   : > { %p3200_p12 = pneg %p3178_p11 }
  0xa0   : > { %s3828_s9 = scalar_select %p3200_p12, 1, 0 }
  0xa2   : > { %s3188_s14 = scalar_lea.hbm %s3827_s1, %s3781_s26  ;;  %s2598_s12 = scalar_lea.hbm %s3827_s1, 2048 }
  0xa3   : > { %s2593_s7 = scalar_lea.hbm %s3188_s14, 1024  ;;  %p2599_p2 = scmp.lt.u32.totalorder %s3188_s14, %s3827_s1 }
  0xa4   : > { %p2594_p3 = scmp.ne.s32.totalorder %s3188_s14, %s2593_s7  ;;  %p2600_p4 = scmp.lt.u32.totalorder %s2598_s12, %s2593_s7 }
  0xa5   : > { %p2602_p1 = scmp.lt.u32.totalorder %s2593_s7, %s3188_s14 }
  0xa6   : > { %p2596_p13 = pnand %p3200_p12, %p2594_p3  ;;  %p2601_p5 = por %p2600_p4, %p2599_p2 }
  0xa8   : > { %p2597_p0 = pneg %p2596_p13  ;;  %p2603_p10 = por %p2602_p1, %p2601_p5 }
  0xaa   : > { %p2604_p9 = pnand %p2603_p10, %p2597_p0 }
  0xac   : > { %2607 = shalt.err (!%p2604_p9)
}
  0xad   : > { %s2608_s0 = scalar_lea.vmem %s3192_s5, 1024  ;;  %s2905_s2 = smov [#allocation11]  }
  0xae   : > { %p2609_p3 = scmp.ne.s32.totalorder %s3192_s5, %s2608_s0  ;;  %s2613_s16 = sshll.u32 %s2905_s2, 4  ;;  %s2614_s16 = int_to_ptr.vmem [resolvable:$false] %s2613_s16 }
  0xaf   : > { %s2615_s26 = scalar_lea.vmem %s2614_s16, 2048  ;;  %p2616_p6 = scmp.lt.s32.totalorder %s3192_s5, %s2614_s16 }
  0xb0   : > { %p2611_p13 = pnand %p2609_p3, %p3200_p12  ;;  %p2617_p8 = scmp.lt.s32.totalorder %s2615_s26, %s2608_s0 }
  0xb2   : > { %p2612_p7 = pneg %p2611_p13  ;;  %p2618_p2 = por %p2617_p8, %p2616_p6 }
  0xb4   : > { %p2619_p4 = pnand %p2618_p2, %p2612_p7 }
  0xb6   : > { %2622 = shalt.err (!%p2619_p4)
}
  0xb7   : > { %s2906_s7 = smov 128   ;;  %s2907_s12 = smov 8  }
  0xb8   : > { %2324 = dma.hbm_to_vmem [thread:$0]  (!%p3178_p11), %s3188_s14, 1024, %s3192_s5, %s3194_s25, %s2906_s7, %s2906_s7, %s2907_s12  }
  0xb9   : > { %s2908_s3 = smov [#allocation16]   ;;  %s2909_s16 = smov [#allocation19]  }
  0xba   : > { %s366_s2 = sshll.u32 %s2908_s3, 4  ;;  %s390_s0 = sshll.u32 %s2909_s16, 4  ;;  %s367_s2 = int_to_ptr.vmem [resolvable:$true] %s366_s2  ;;  %s391_s0 = int_to_ptr.vmem [resolvable:$true] %s390_s0 }
  0xbb   : > { %s3829_s4 = sld [smem:[#allocation45_spill]]  ;;  %p3830_p8 = scmp.ne.s32.totalorder %s3814_s11, 0 }
  0xc1   : > { %s2623_s24 = scalar_lea.hbm %s3829_s4, 16 }
  0xc2   : > { %p2624_p6 = scmp.ne.s32.totalorder %s3829_s4, %s2623_s24  ;;  %p2630_p10 = scmp.lt.u32.totalorder %s2623_s24, %s3829_s4 }
  0xc4   : > { %p2626_p7 = pnand %p2624_p6, %p3830_p8 }
  0xc6   : > { %p2627_p9 = pneg %p2626_p7 }
  0xc8   : > { %p2632_p0 = pnand %p2630_p10, %p2627_p9 }
  0xca   : > { %2635 = shalt.err (!%p2632_p0)
}
  0xcb   : > { %s2636_s5 = scalar_lea.vmem %s367_s2, 16  ;;  %s2643_s1 = scalar_lea.vmem %s367_s2, 32 }
  0xcc   : > { %p2637_p5 = scmp.ne.s32.totalorder %s367_s2, %s2636_s5  ;;  %p2644_p13 = scmp.lt.s32.totalorder %s367_s2, %s367_s2 }
  0xcd   : > { %p2645_p2 = scmp.lt.s32.totalorder %s2643_s1, %s2636_s5 }
  0xce   : > { %p2639_p1 = pnand %p2637_p5, %p3830_p8 }
  0xcf   : > { %p2646_p4 = por %p2645_p2, %p2644_p13 }
  0xd0   : > { %p2640_p3 = pneg %p2639_p1 }
  0xd2   : > { %p2647_p11 = pnand %p2646_p4, %p2640_p3 }
  0xd4   : > { %2650 = shalt.err (!%p2647_p11)
}
  0xd5   : > { %p3831_p6 = scmp.ne.s32.totalorder %s3812_s27, 0  ;;  %s2651_s30 = scalar_lea.hbm %s3768_s6, 16 }
  0xd6   : > { %p2652_p7 = scmp.ne.s32.totalorder %s3768_s6, %s2651_s30  ;;  %p2658_p11 = scmp.lt.u32.totalorder %s2651_s30, %s3768_s6 }
  0xd7   : > { %2299 = dma.hbm_to_vmem [thread:$0]  (!%p3831_p6), %s3829_s4, 16, %s367_s2, [#allocation15]  }
  0xd8   : > { %p2654_p9 = pnand %p2652_p7, %p3830_p8 }
  0xda   : > { %p2655_p10 = pneg %p2654_p9 }
  0xdc   : > { %p2660_p0 = pnand %p2658_p11, %p2655_p10 }
  0xde   : > { %2663 = shalt.err (!%p2660_p0)
}
  0xdf   : > { %s2664_s5 = scalar_lea.vmem %s391_s0, 16  ;;  %s2671_s2 = scalar_lea.vmem %s391_s0, 32 }
  0xe0   : > { %p2665_p5 = scmp.ne.s32.totalorder %s391_s0, %s2664_s5  ;;  %p2672_p13 = scmp.lt.s32.totalorder %s391_s0, %s391_s0 }
  0xe1   : > { %p2673_p2 = scmp.lt.s32.totalorder %s2671_s2, %s2664_s5 }
  0xe2   : > { %p2667_p1 = pnand %p2665_p5, %p3830_p8 }
  0xe3   : > { %p2674_p4 = por %p2673_p2, %p2672_p13 }
  0xe4   : > { %p2668_p3 = pneg %p2667_p1 }
  0xe6   : > { %p2675_p12 = pnand %p2674_p4, %p2668_p3 }
  0xe8   : > { %2678 = shalt.err (!%p2675_p12)
}
  0xe9   : > { %2305 = dma.hbm_to_vmem [thread:$0]  (!%p3831_p6), %s3768_s6, 16, %s391_s0, [#allocation18]  }
  0xea   : > { %s2910_s28 = smov [#allocation22]   ;;  %s2911_s24 = smov [#allocation25]  }
  0xeb   : > { %s414_s22 = sshll.u32 %s2910_s28, 4  ;;  %s438_s30 = sshll.u32 %s2911_s24, 4  ;;  %s415_s22 = int_to_ptr.vmem [resolvable:$true] %s414_s22  ;;  %s439_s30 = int_to_ptr.vmem [resolvable:$true] %s438_s30 }
  0xec   : > { %s2679_s16 = scalar_lea.hbm %s3770_s8, 16 }
  0xed   : > { %p2680_p12 = scmp.ne.s32.totalorder %s3770_s8, %s2679_s16  ;;  %p2686_p10 = scmp.lt.u32.totalorder %s2679_s16, %s3770_s8 }
  0xef   : > { %p2682_p7 = pnand %p2680_p12, %p3830_p8 }
  0xf1   : > { %p2683_p9 = pneg %p2682_p7 }
  0xf3   : > { %p2688_p11 = pnand %p2686_p10, %p2683_p9 }
  0xf5   : > { %2691 = shalt.err (!%p2688_p11)
}
  0xf6   : > { %s2692_s0 = scalar_lea.vmem %s415_s22, 16  ;;  %s2699_s19 = scalar_lea.vmem %s415_s22, 32 }
  0xf7   : > { %p2693_p0 = scmp.ne.s32.totalorder %s415_s22, %s2692_s0  ;;  %p2700_p3 = scmp.lt.s32.totalorder %s415_s22, %s415_s22 }
  0xf8   : > { %p2701_p13 = scmp.lt.s32.totalorder %s2699_s19, %s2692_s0 }
  0xf9   : > { %p2695_p5 = pnand %p2693_p0, %p3830_p8 }
  0xfa   : > { %p2702_p2 = por %p2701_p13, %p2700_p3 }
  0xfb   : > { %p2696_p1 = pneg %p2695_p5 }
  0xfd   : > { %p2703_p4 = pnand %p2702_p2, %p2696_p1 }
  0xff   : > { %2706 = shalt.err (!%p2703_p4)
}
 0x100   : > { %2311 = dma.hbm_to_vmem [thread:$0]  (!%p3831_p6), %s3770_s8, 16, %s415_s22, [#allocation21]  }
 0x101   : > { %s2707_s16 = scalar_lea.hbm %s3772_s10, 16 }
 0x102   : > { %p2708_p12 = scmp.ne.s32.totalorder %s3772_s10, %s2707_s16  ;;  %p2714_p10 = scmp.lt.u32.totalorder %s2707_s16, %s3772_s10 }
 0x104   : > { %p2710_p7 = pnand %p2708_p12, %p3830_p8 }
 0x106   : > { %p2711_p9 = pneg %p2710_p7 }
 0x108   : > { %p2716_p11 = pnand %p2714_p10, %p2711_p9 }
 0x10a   : > { %2719 = shalt.err (!%p2716_p11)
}
 0x10b   : > { %s2720_s0 = scalar_lea.vmem %s439_s30, 16  ;;  %s2727_s22 = scalar_lea.vmem %s439_s30, 32 }
 0x10c   : > { %p2721_p0 = scmp.ne.s32.totalorder %s439_s30, %s2720_s0  ;;  %p2728_p3 = scmp.lt.s32.totalorder %s439_s30, %s439_s30 }
 0x10d   : > { %p2729_p13 = scmp.lt.s32.totalorder %s2727_s22, %s2720_s0 }
 0x10e   : > { %p2723_p5 = pnand %p2721_p0, %p3830_p8 }
 0x10f   : > { %p2730_p2 = por %p2729_p13, %p2728_p3 }
 0x110   : > { %p2724_p1 = pneg %p2723_p5 }
 0x112   : > { %p2731_p4 = pnand %p2730_p2, %p2724_p1 }
 0x114   : > { %2734 = shalt.err (!%p2731_p4)
}
 0x115   : > { %2317 = dma.hbm_to_vmem [thread:$0]  (!%p3831_p6), %s3772_s10, 16, %s439_s30, [#allocation24]  }
 0x116   : > { %s3832_s11 = sshll.u32 %s2893_s21, 10  ;;  %s3833_s3 = sld [smem:[#allocation41_spill]] }
 0x117   : > { %s3834_s26 = sshll.u32 %s3172_s13, 6  ;;  %s2030_s2 = sshll.u32 %s3172_s13, 1 }
 0x118   : > { %s453_s27 = scalar_lea.vmem [#allocation8], %s3834_s26  ;;  %s450_s1 = scalar_lea.sflag [#allocation9], %s3172_s13 }
 0x119   : > { %s462_s5 = sshll.u32 %s453_s27, 4  ;;  %p3835_p6 = scmp.ne.s32.totalorder %s3828_s9, 0  ;;  %s3309_s5 = int_to_ptr.vmem [resolvable:$true] %s462_s5 }
 0x11c   : > { %s3304_s16 = scalar_lea.hbm %s3833_s3, %s3832_s11  ;;  %s2740_s19 = scalar_lea.hbm %s3833_s3, 2048 }
 0x11d   : > { %s2735_s0 = scalar_lea.hbm %s3304_s16, 1024  ;;  %p2741_p9 = scmp.lt.u32.totalorder %s3304_s16, %s3833_s3 }
 0x11e   : > { %p2736_p8 = scmp.ne.s32.totalorder %s3304_s16, %s2735_s0  ;;  %p2742_p10 = scmp.lt.u32.totalorder %s2740_s19, %s2735_s0 }
 0x11f   : > { %p2744_p0 = scmp.lt.u32.totalorder %s2735_s0, %s3304_s16 }
 0x120   : > { %p2738_p12 = pnand %p2736_p8, %p3835_p6  ;;  %p2743_p11 = por %p2742_p10, %p2741_p9 }
 0x122   : > { %p2739_p7 = pneg %p2738_p12  ;;  %p2745_p5 = por %p2744_p0, %p2743_p11 }
 0x124   : > { %p2746_p1 = pnand %p2745_p5, %p2739_p7 }
 0x126   : > { %2749 = shalt.err (!%p2746_p1)
}
 0x127   : > { %s2750_s24 = scalar_lea.vmem %s3309_s5, 1024  ;;  %s2912_s14 = smov [#allocation8]  }
 0x128   : > { %p2751_p3 = scmp.ne.s32.totalorder %s3309_s5, %s2750_s24  ;;  %s2755_s26 = sshll.u32 %s2912_s14, 4  ;;  %s2756_s26 = int_to_ptr.vmem [resolvable:$false] %s2755_s26 }
 0x129   : > { %s2757_s27 = scalar_lea.vmem %s2756_s26, 2048  ;;  %p2758_p4 = scmp.lt.s32.totalorder %s3309_s5, %s2756_s26 }
 0x12a   : > { %p2753_p13 = pnand %p2751_p3, %p3835_p6  ;;  %p2759_p8 = scmp.lt.s32.totalorder %s2757_s27, %s2750_s24 }
 0x12c   : > { %p2754_p2 = pneg %p2753_p13  ;;  %p2760_p12 = por %p2759_p8, %p2758_p4 }
 0x12e   : > { %p2761_p9 = pnand %p2760_p12, %p2754_p2 }
 0x130   : > { %2764 = shalt.err (!%p2761_p9)
}
 0x131   : > { %p3836_p7 = scmp.ne.s32.totalorder %s3826_s29, 0  ;;  %s2031_s0 = sshll.u32 %s2893_s21, 5 }
 0x132   : > { %s501_s30 = scalar_lea.vmem [#allocation13], %s2030_s2  ;;  %s3837_s11 = sld [smem:[#allocation43_spill]] }
 0x133   : > { %2321 = dma.hbm_to_vmem [thread:$0]  (!%p3836_p7), %s3304_s16, 1024, %s3309_s5, %s450_s1, %s2906_s7, %s2906_s7, %s2907_s12  }
 0x134   : > { %s508_s22 = sshll.u32 %s501_s30, 4  ;;  %s509_s22 = int_to_ptr.vmem [resolvable:$true] %s508_s22 }
 0x138   : > { %s506_s24 = scalar_lea.hbm %s3837_s11, %s2031_s0  ;;  %s2770_s3 = scalar_lea.hbm %s3837_s11, 64 }
 0x139   : > { %s2765_s14 = scalar_lea.hbm %s506_s24, 32  ;;  %p2771_p5 = scmp.lt.u32.totalorder %s506_s24, %s3837_s11 }
 0x13a   : > { %p2766_p10 = scmp.ne.s32.totalorder %s506_s24, %s2765_s14  ;;  %p2772_p1 = scmp.lt.u32.totalorder %s2770_s3, %s2765_s14 }
 0x13b   : > { %p2774_p13 = scmp.lt.u32.totalorder %s2765_s14, %s506_s24 }
 0x13c   : > { %p2768_p11 = pnand %p2766_p10, %p3835_p6  ;;  %p2773_p3 = por %p2772_p1, %p2771_p5 }
 0x13e   : > { %p2769_p0 = pneg %p2768_p11  ;;  %p2775_p2 = por %p2774_p13, %p2773_p3 }
 0x140   : > { %p2776_p4 = pnand %p2775_p2, %p2769_p0 }
 0x142   : > { %2779 = shalt.err (!%p2776_p4)
}
 0x143   : > { %s2780_s13 = scalar_lea.vmem %s509_s22, 32  ;;  %s2913_s12 = smov [#allocation13]  }
 0x144   : > { %p2781_p8 = scmp.ne.s32.totalorder %s509_s22, %s2780_s13  ;;  %s2785_s16 = sshll.u32 %s2913_s12, 4  ;;  %s2786_s16 = int_to_ptr.vmem [resolvable:$false] %s2785_s16 }
 0x145   : > { %s2787_s5 = scalar_lea.vmem %s2786_s16, 64  ;;  %p2788_p10 = scmp.lt.s32.totalorder %s509_s22, %s2786_s16 }
 0x146   : > { %p2783_p12 = pnand %p2781_p8, %p3835_p6  ;;  %p2789_p11 = scmp.lt.s32.totalorder %s2787_s5, %s2780_s13 }
 0x148   : > { %p2784_p9 = pneg %p2783_p12  ;;  %p2790_p7 = por %p2789_p11, %p2788_p10 }
 0x14a   : > { %p2791_p1 = pnand %p2790_p7, %p2784_p9 }
 0x14c   : > { %2794 = shalt.err (!%p2791_p1)
}
 0x14d   : > { %p3838_p5 = scmp.ne.s32.totalorder %s3826_s29, 0  ;;  %s3839_s4 = sld [smem:[#allocation37_spill]] }
 0x14f   : > { %2327 = dma.hbm_to_vmem [thread:$0]  (!%p3838_p5), %s506_s24, 32, %s509_s22, %s3194_s25  }
 0x153   : > { %p3840_p0 = scmp.ne.s32.totalorder %s3839_s4, 0 }
 0x154   : > { %s3360_s9 = sand.u32 (!%p3840_p0), 1, %s2881_s18   ;;  %p3841_p6 = scmp.ne.s32.totalorder (!%p3840_p0), %s3821_s15, 0 }
 0x155   : > { %517 = sbr.rel (%p3840_p0) target bundleno = 1698 (0x6a2), region = 64  ;;  %s3363_s3 = sshll.u32 (!%p3840_p0), %s3360_s9, 6 }
 0x156   : > { %s520_s2 = scalar_lea.sflag (!%p3840_p0), [#allocation9], %s3360_s9  ;;  %s3367_s1 = scalar_lea.vmem (!%p3840_p0), [#allocation8], %s3363_s3 }
 0x15c   : > { %2848 = dma.done.wait (%p3841_p6), %s520_s2, 1024  }
 0x15d   : > { %2850 = vsyncadd (%p3841_p6), %s520_s2, 4294966272  ;;  %s528_s29 = sand.u32 1, %s3011_s23   ;;  %s3375_s0 = scalar_lea.vmem [#allocation11], %s3363_s3 }
 0x15e   : > { %s529_s25 = scalar_lea.sflag [#allocation12], %s528_s29 }
 0x15f   : > { %2852 = dma.done.wait (%p3841_p6), %s529_s25, 1056  }
 0x160   : > { %2854 = vsyncadd (%p3841_p6), %s529_s25, 4294966240  ;;  %s2035_s30 = sshll.u32 %s3360_s9, 1  ;;  %p3842_p7 = scmp.eq.s32.totalorder %s3011_s23, 0 }
 0x161   : > { %s541_s22 = scalar_lea.vmem [#allocation13], %s2035_s30 }
 0x162   : > { %2856 = dma.done.wait (%p3842_p7), [#allocation15], 528   ;;  %p3843_p3 = pmov %p3842_p7 }
 0x164   : > { %2858 = vsyncadd (%p3843_p3), [#allocation15], 4294966768  ;;  %p3844_p13 = pmov %p3843_p3 }
 0x165   : > { %p3845_p2 = pmov %p3843_p3 }
 0x166   : > { %2860 = dma.done.wait (%p3844_p13), [#allocation18], 528  }
 0x167   : > { %2862 = vsyncadd (%p3845_p2), [#allocation18], 4294966768  ;;  %p3846_p4 = pmov %p3845_p2 }
 0x168   : > { %p3847_p8 = pmov %p3845_p2 }
 0x169   : > { %2864 = dma.done.wait (%p3846_p4), [#allocation21], 528  }
 0x16a   : > { %2866 = vsyncadd (%p3847_p8), [#allocation21], 4294966768  ;;  %p3848_p12 = pmov %p3845_p2 }
 0x16b   : > { %p3849_p9 = pmov %p3845_p2 }
 0x16c   : > { %2868 = dma.done.wait (%p3848_p12), [#allocation24], 528  }
 0x16d   : > { %2870 = vsyncadd (%p3849_p9), [#allocation24], 4294966768  ;;  %v642_v0 = vlaneseq  ;;  %v2417_v2 = vld [vmem:[#allocation17] sm:$0xff]   ;;  %v2418_v4 = vld [vmem:[#allocation17 + $0x8] sm:$0xff]   ;;  %vm709_vm0 = vcmask 523264   ;;  %vm1078_vm1 = vcmask 7168  }
 0x16e   : > { %2145 = vmatprep.subr.bf16.mxu0 %v2417_v2  ;;  %v2419_v6 = vld [vmem:[#allocation17 + $0x10] sm:$0xff]   ;;  %v628_v7 = vld [vmem:[%s541_s22] sm:$0x3]  ;;  %v635_v9 = vld [vmem:[%s3375_s0 + $0x8] sm:$0xff]  ;;  %s3850_s23 = sld [smem:[#allocation35_spill]]  ;;  %s621_s15 = scalar_lea.vmem [#allocation26], %s3363_s3 }
 0x16f   : > { %v643_v1 = vshrl.u32 %v642_v0, 7  ;;  %2146 = vmatpush3.bf16.msra.mxu0 %v2417_v2  ;;  %v634_v8 = vld [vmem:[%s3375_s0] sm:$0xff]  ;;  %v636_v12 = vld [vmem:[%s3375_s0 + $0x10] sm:$0xff]  ;;  %v637_v13 = vld [vmem:[%s3375_s0 + $0x18] sm:$0xff]  ;;  %s1792_s28 = sshll.u32 %s621_s15, 4  ;;  %s3851_s26 = sld [smem:[#allocation49_spill]]  ;;  %s3710_s28 = int_to_ptr.vmem [resolvable:$true] %s1792_s28 }
 0x170   : > { %2147 = vmatprep.subr.bf16.mxu0 %v2418_v4  ;;  %v638_v14 = vld [vmem:[%s3375_s0 + $0x20] sm:$0xff]  ;;  %v639_v15 = vld [vmem:[%s3375_s0 + $0x28] sm:$0xff]  ;;  %v640_v30 = vld [vmem:[%s3375_s0 + $0x30] sm:$0xff]  ;;  %s1777_s7 = scalar_lea.sflag [#allocation10], %s3360_s9  ;;  %s2795_s13 = scalar_lea.vmem %s3710_s28, 1024 }
 0x171   : > { %v644_v3 = vsub.s32 0, %v643_v1  ;;  %v656_v5 = vsub.s32 1, %v643_v1  ;;  %v2420_v20 = vld [vmem:[#allocation17 + $0x18] sm:$0xff]   ;;  %v918_v34 = vld [vmem:[%s3367_s1 + $0x8] sm:$0xff]  ;;  %v2426_v43 = vld [vmem:[#allocation20 + $0x8] sm:$0xff]   ;;  %p2796_p10 = scmp.ne.s32.totalorder %s3710_s28, %s2795_s13  ;;  %p3852_p11 = scmp.ne.s32.totalorder %s3822_s20, 0 }
 0x172   : > { %v641_v31 = vld [vmem:[%s3375_s0 + $0x38] sm:$0xff]  ;;  %v2421_v32 = vld [vmem:[#allocation14] sm:$0xff]   ;;  %v2422_v38 = vld [vmem:[#allocation14 + $0x8] sm:$0xff]   ;;  %s2917_s12 = smov [#allocation26]  }
 0x173   : > { %v3400_v10 = vrot.slane %v628_v7, %v644_v3  ;;  %v3402_v11 = vrot.slane %v628_v7, %v656_v5  ;;  %2148 = vmatpush3.bf16.msra.mxu0 %v2418_v4  ;;  %v917_v33 = vld [vmem:[%s3367_s1] sm:$0xff]  ;;  %v2425_v39 = vld [vmem:[#allocation20] sm:$0xff]   ;;  %v919_v44 = vld [vmem:[%s3367_s1 + $0x10] sm:$0xff]  ;;  %p2797_p1 = pnand %p2796_p10, %p3852_p11  ;;  %s2799_s16 = sshll.u32 %s2917_s12, 4  ;;  %s2800_s16 = int_to_ptr.vmem [resolvable:$false] %s2799_s16 }
 0x174   : > { %2149 = vmatprep.subr.bf16.mxu0 %v2419_v6  ;;  %2161 = vmatprep.subr.bf16.mxu1 %v2425_v39  ;;  %v920_v49 = vld [vmem:[%s3367_s1 + $0x18] sm:$0xff]  ;;  %v921_v51 = vld [vmem:[%s3367_s1 + $0x20] sm:$0xff]  ;;  %v922_v52 = vld [vmem:[%s3367_s1 + $0x28] sm:$0xff]  ;;  %s2096_s19 = sshll.u32 %s3850_s23, 10  ;;  %s2801_s5 = scalar_lea.vmem %s2800_s16, 2048 }
 0x175   : > { %v646_v16 = vmul.f32 %v3400_v10, %v634_v8  ;;  %v647_v17 = vmul.f32 %v3400_v10, %v635_v9  ;;  %v648_v18 = vmul.f32 %v3400_v10, %v636_v12  ;;  %v649_v19 = vmul.f32 %v3400_v10, %v637_v13  ;;  %2162 = vmatpush3.bf16.msra.mxu1 %v2425_v39  ;;  %v2423_v50 = vld [vmem:[#allocation14 + $0x10] sm:$0xff]   ;;  %v2424_v59 = vld [vmem:[#allocation14 + $0x18] sm:$0xff]   ;;  %s3708_s27 = scalar_lea.hbm %s3851_s26, %s2096_s19  ;;  %p2798_p5 = pneg %p2797_p1 }
 0x176   : > { %v650_v21 = vmul.f32 %v3400_v10, %v638_v14  ;;  %v651_v22 = vmul.f32 %v3400_v10, %v639_v15  ;;  %v652_v36 = vmul.f32 %v3400_v10, %v640_v30  ;;  %v653_v37 = vmul.f32 %v3400_v10, %v641_v31  ;;  %2163 = vmatprep.subr.bf16.mxu1 %v2426_v43  ;;  %v923_v0 = vld [vmem:[%s3367_s1 + $0x30] sm:$0xff]  ;;  %v924_v1 = vld [vmem:[%s3367_s1 + $0x38] sm:$0xff]  ;;  %v2428_v12 = vld [vmem:[#allocation20 + $0x18] sm:$0xff]   ;;  %p2802_p0 = scmp.lt.s32.totalorder %s3710_s28, %s2800_s16  ;;  %p2803_p6 = scmp.lt.s32.totalorder %s2801_s5, %s2795_s13 }
 0x177   : > { %v658_v23 = vadd.f32 %v3402_v11, %v646_v16  ;;  %v659_v24 = vadd.f32 %v3402_v11, %v647_v17  ;;  %v660_v25 = vadd.f32 %v3402_v11, %v648_v18  ;;  %v661_v26 = vadd.f32 %v3402_v11, %v649_v19  ;;  %2150 = vmatpush3.bf16.msra.mxu0 %v2419_v6  ;;  %v2427_v9 = vld [vmem:[#allocation20 + $0x10] sm:$0xff]  }
 0x178   : > { %v662_v28 = vadd.f32 %v3402_v11, %v650_v21  ;;  %v663_v29 = vadd.f32 %v3402_v11, %v651_v22  ;;  %2151 = vmatprep.subr.bf16.mxu0 %v2420_v20  ;;  %v929_v41 = vmul.f32 %v917_v33, %v3400_v10  ;;  %v930_v42 = vmul.f32 %v918_v34, %v3400_v10  ;;  %p2804_p7 = por %p2803_p6, %p2802_p0 }
 0x179   : > { %v666_v27 = vpack.c.bf16 %v659_v24, %v658_v23  ;;  %v3425_v35 = vpack.c.bf16 %v661_v26, %v660_v25  ;;  %v664_v45 = vadd.f32 %v3402_v11, %v652_v36  ;;  %v665_v46 = vadd.f32 %v3402_v11, %v653_v37  ;;  %2164 = vmatpush3.bf16.msra.mxu1 %v2426_v43 }
 0x17a   : > { %v668_v40 = vpack.c.bf16 %v663_v29, %v662_v28  ;;  %v941_v47 = vadd.f32 %v929_v41, %v3402_v11  ;;  %v942_v48 = vadd.f32 %v930_v42, %v3402_v11  ;;  %v931_v54 = vmul.f32 %v919_v44, %v3400_v10  ;;  %2165 = vmatprep.subr.bf16.mxu1 %v2427_v9  ;;  %p2805_p3 = pnand %p2804_p7, %p2798_p5 }
 0x17b   : > { %2153 = vmatprep.mubr.msk.bf16.mxu0 %vm709_vm0, %v666_v27  ;;  %2169 = vmatprep.mubr.msk.bf16.mxu1 %vm709_vm0, %v666_v27  ;;  %v669_v53 = vpack.c.bf16 %v665_v46, %v664_v45  ;;  %v932_v55 = vmul.f32 %v920_v49, %v3400_v10  ;;  %v933_v57 = vmul.f32 %v921_v51, %v3400_v10 }
 0x17c   : > { %2152 = vmatpush3.bf16.msra.mxu0 %v2420_v20  ;;  %v949_v56 = vpack.c.bf16 %v942_v48, %v941_v47  ;;  %v934_v58 = vmul.f32 %v922_v52, %v3400_v10  ;;  %v943_v60 = vadd.f32 %v931_v54, %v3402_v11  ;;  %v935_v3 = vmul.f32 %v923_v0, %v3400_v10 }
 0x17d   : > { %2177 = vmatprep.subr.bf16.mxu0 %v2421_v32  ;;  %v944_v61 = vadd.f32 %v932_v55, %v3402_v11  ;;  %v945_v62 = vadd.f32 %v933_v57, %v3402_v11  ;;  %v936_v4 = vmul.f32 %v924_v1, %v3400_v10  ;;  %2166 = vmatpush3.bf16.msra.mxu1 %v2427_v9  ;;  %v2054_v1 = vld [vmem:[#allocation22] ss:$0 sm:$0xff] }
 0x17e   : > { %v946_v63 = vadd.f32 %v934_v58, %v3402_v11  ;;  %v947_v6 = vadd.f32 %v935_v3, %v3402_v11  ;;  %2167 = vmatprep.subr.bf16.mxu1 %v2428_v12 }
 0x17f   : > { %2154 = vmatmul.mubr.msk.bf16.vlgmr.msra.gmra.mrb[0].mxu0 %vm709_vm0, %v3425_v35  ;;  %v950_v2 = vpack.c.bf16 %v944_v61, %v943_v60  ;;  %v948_v7 = vadd.f32 %v936_v4, %v3402_v11  ;;  %v2045_v11 = vld [vmem:[#allocation19] ss:$0 sm:$0xff] }
 0x180   : > { %2157 = vmatprep.mubr.msk.bf16.mxu0 %vm709_vm0, %v668_v40  ;;  %2178 = vmatpush3.bf16.msra.mxu0 %v2421_v32  ;;  %v951_v5 = vpack.c.bf16 %v946_v63, %v945_v62  ;;  %v2063_v32 = vld [vmem:[#allocation16] ss:$0 sm:$0xff] }
 0x181   : > { %2179 = vmatprep.subr.bf16.mxu0 %v2422_v38  ;;  %v952_v8 = vpack.c.bf16 %v948_v7, %v947_v6  ;;  %2168 = vmatpush3.bf16.msra.mxu1 %v2428_v12 }
 0x184   : > { %2180 = vmatpush3.bf16.msra.mxu0 %v2422_v38  ;;  %2170 = vmatmul.mubr.msk.bf16.vlgmr.msra.gmra.mrb[0].mxu1 %vm709_vm0, %v3425_v35 }
 0x185   : > { %2181 = vmatprep.subr.bf16.mxu0 %v2423_v50  ;;  %2173 = vmatprep.mubr.msk.bf16.mxu1 %vm709_vm0, %v668_v40 }
 0x187   : > { %2158 = vmatmul.mubr.msk.bf16.gmra.mrb[4].mxu0 %vm709_vm0, %v669_v53 }
 0x188   : > { %2182 = vmatpush3.bf16.msra.mxu0 %v2423_v50  ;;  %2185 = vmatprep.mubr.msk.bf16.mxu0 %vm709_vm0, %v949_v56 }
 0x189   : > { %2183 = vmatprep.subr.bf16.mxu0 %v2424_v59 }
 0x18c   : > { %2184 = vmatpush3.bf16.msra.mxu0 %v2424_v59  ;;  %2174 = vmatmul.mubr.msk.bf16.gmra.mrb[4].mxu1 %vm709_vm0, %v669_v53 }
 0x18f   : > { %2186 = vmatmul.mubr.msk.bf16.vlgmr.msra.gmra.mrb[8].mxu0 %vm709_vm0, %v950_v2 }
 0x190   : > { %2189 = vmatprep.mubr.msk.bf16.mxu0 %vm709_vm0, %v951_v5 }
 0x197   : > { %2190 = vmatmul.mubr.msk.bf16.gmra.mrb[12].mxu0 %vm709_vm0, %v952_v8 }
 0x252   : > { %v2155_v10 = vpop.f32.mrb[0].mxu0 }
 0x253   : > { %v756_v13 = vpop.f32.mrb[1].mxu0  ;;  %v765_v15 = vadd.f32 %v2155_v10, %v2045_v11 }
 0x254   : > { %v2156_v14 = vpop.f32.mrb[2].mxu0  ;;  %v757_v18 = vadd.f32 %v2045_v11, %v756_v13 }
 0x255   : > { %v768_v16 = vadd.f32 %v2156_v14, %v2045_v11  ;;  %v759_v17 = vpop.f32.mrb[3].mxu0 }
 0x256   : > { %v760_v19 = vadd.f32 %v2045_v11, %v759_v17 }
 0x257   : > { %v892_v20 = vpack.c.bf16 %v768_v16, %v765_v15  ;;  %v2171_v2 = vpop.f32.mrb[0].mxu1 }
 0x258   : > { %v891_v21 = vpack.c.bf16 %v760_v19, %v757_v18  ;;  %v869_v3 = vadd.f32 %v2171_v2, %v2054_v1  ;;  %v860_v4 = vpop.f32.mrb[1].mxu1 }
 0x259   : > { %900 = vst.msk [vmem:[#allocation3 + $0x8] sm:$0xff] %vm709_vm0, %v892_v20  ;;  %v861_v5 = vadd.f32 %v2054_v1, %v860_v4  ;;  %v2172_v6 = vpop.f32.mrb[2].mxu1 }
 0x25a   : > { %899 = vst.msk [vmem:[#allocation3] sm:$0xff] %vm709_vm0, %v891_v21  ;;  %v2159_v22 = vpop.f32.mrb[4].mxu0  ;;  %v872_v7 = vadd.f32 %v2172_v6, %v2054_v1  ;;  %v863_v8 = vpop.f32.mrb[3].mxu1 }
 0x25b   : > { %v781_v23 = vadd.f32 %v2159_v22, %v2045_v11  ;;  %v772_v24 = vpop.f32.mrb[5].mxu0  ;;  %v864_v9 = vadd.f32 %v2054_v1, %v863_v8 }
 0x25c   : > { %v773_v25 = vadd.f32 %v2045_v11, %v772_v24  ;;  %v2160_v26 = vpop.f32.mrb[6].mxu0  ;;  %v904_v12 = vpack.c.bf16 %v872_v7, %v869_v3 }
 0x25d   : > { %v784_v27 = vadd.f32 %v2160_v26, %v2045_v11  ;;  %v775_v28 = vpop.f32.mrb[7].mxu0  ;;  %v903_v10 = vpack.c.bf16 %v864_v9, %v861_v5  ;;  %v2914_v26 = vmov -inf  }
 0x25e   : > { %v776_v29 = vadd.f32 %v2045_v11, %v775_v28  ;;  %910 = vst.msk [vmem:[#allocation4 + $0x8] sm:$0xff] %vm709_vm0, %v904_v12 }
 0x25f   : > { %v894_v30 = vpack.c.bf16 %v784_v27, %v781_v23  ;;  %909 = vst.msk [vmem:[#allocation4] sm:$0xff] %vm709_vm0, %v903_v10  ;;  %v2175_v11 = vpop.f32.mrb[4].mxu1 }
 0x260   : > { %v893_v31 = vpack.c.bf16 %v776_v29, %v773_v25  ;;  %v1108_v36 = vld [vmem:[#allocation3 + $0x8] sm:$0xff]  ;;  %v885_v13 = vadd.f32 %v2175_v11, %v2054_v1  ;;  %v876_v14 = vpop.f32.mrb[5].mxu1  ;;  %1081 = vst.msk [vmem:[#allocation5 + $0x10] sm:$0xff] %vm1078_vm1, %v2914_v26  ;;  %1079 = vst.msk [vmem:[#allocation5] sm:$0xff] %vm1078_vm1, %v2914_v26 }
 0x261   : > { %902 = vst.msk [vmem:[#allocation3 + $0x18] sm:$0xff] %vm709_vm0, %v894_v30  ;;  %v1107_v33 = vld [vmem:[#allocation3] sm:$0xff]  ;;  %v1138_v47 = vsel %vm709_vm0, %v1108_v36, 0  ;;  %v877_v15 = vadd.f32 %v2054_v1, %v876_v14  ;;  %v2176_v16 = vpop.f32.mrb[6].mxu1 }
 0x262   : > { %901 = vst.msk [vmem:[#allocation3 + $0x10] sm:$0xff] %vm709_vm0, %v893_v31  ;;  %2249 = vmatprep.subr.msk.bf16.mxu1 %vm709_vm0, %v1107_v33  ;;  %v1135_v34 = vsel %vm709_vm0, %v1107_v33, 0  ;;  %v2187_v35 = vpop.f32.mrb[8].mxu0  ;;  %v888_v17 = vadd.f32 %v2176_v16, %v2054_v1  ;;  %v879_v18 = vpop.f32.mrb[7].mxu1 }
 0x263   : > { %2194 = vmatpush3.bf16.xpose.msra.mxu1 %v1135_v34  ;;  %v1048_v37 = vadd.f32 %v2187_v35, %v2063_v32  ;;  %v1039_v38 = vpop.f32.mrb[9].mxu0  ;;  %v880_v19 = vadd.f32 %v2054_v1, %v879_v18  ;;  %1080 = vst.msk [vmem:[#allocation5 + $0x8] sm:$0xff] %vm1078_vm1, %v2914_v26  ;;  %1082 = vst.msk [vmem:[#allocation5 + $0x18] sm:$0xff] %vm1078_vm1, %v2914_v26 }
 0x264   : > { %2250 = vmatprep.subr.msk.bf16.mxu1 %vm709_vm0, %v1108_v36  ;;  %v1040_v39 = vadd.f32 %v2063_v32, %v1039_v38  ;;  %v2188_v40 = vpop.f32.mrb[10].mxu0  ;;  %v906_v20 = vpack.c.bf16 %v888_v17, %v885_v13  ;;  %1083 = vst.msk [vmem:[#allocation5 + $0x20] sm:$0xff] %vm1078_vm1, %v2914_v26  ;;  %1084 = vst.msk [vmem:[#allocation5 + $0x28] sm:$0xff] %vm1078_vm1, %v2914_v26 }
 0x265   : > { %v1051_v41 = vadd.f32 %v2188_v40, %v2063_v32  ;;  %v1042_v42 = vpop.f32.mrb[11].mxu0  ;;  %v905_v21 = vpack.c.bf16 %v880_v19, %v877_v15  ;;  %v1114_v23 = vld [vmem:[#allocation4 + $0x8] sm:$0xff]  ;;  %1085 = vst.msk [vmem:[#allocation5 + $0x30] sm:$0xff] %vm1078_vm1, %v2914_v26  ;;  %1086 = vst.msk [vmem:[#allocation5 + $0x38] sm:$0xff] %vm1078_vm1, %v2914_v26 }
 0x266   : > { %v1043_v43 = vadd.f32 %v2063_v32, %v1042_v42  ;;  %v1113_v22 = vld [vmem:[#allocation4] sm:$0xff]  ;;  %912 = vst.msk [vmem:[#allocation4 + $0x18] sm:$0xff] %vm709_vm0, %v906_v20 }
 0x267   : > { %v1071_v44 = vpack.c.bf16 %v1051_v41, %v1048_v37  ;;  %2209 = vmatprep.subr.bf16.mxu0 %v1113_v22  ;;  %911 = vst.msk [vmem:[#allocation4 + $0x10] sm:$0xff] %vm709_vm0, %v905_v21 }
 0x268   : > { %v1070_v45 = vpack.c.bf16 %v1043_v43, %v1040_v39  ;;  %v1110_v60 = vld [vmem:[#allocation3 + $0x18] sm:$0xff]  ;;  %2210 = vmatpush3.bf16.msra.mxu0 %v1113_v22  ;;  %v2915_v43 = vmov 0  }
 0x269   : > { %v1109_v46 = vld [vmem:[#allocation3 + $0x10] sm:$0xff]  ;;  %1075 = vst.msk [vmem:[#allocation2 + $0x8] sm:$0xff] %vm709_vm0, %v1071_v44  ;;  %v1144_v61 = vsel %vm709_vm0, %v1110_v60, 0  ;;  %2211 = vmatprep.subr.bf16.mxu0 %v1114_v23  ;;  %2415 = vset.pattern.permute.xlu0 %v2915_v43  ;;  %v2916_v44 = vmov 0.0  }
 0x26a   : > { %1074 = vst.msk [vmem:[#allocation2] sm:$0xff] %vm709_vm0, %v1070_v45  ;;  %v2191_v48 = vpop.f32.mrb[12].mxu0  ;;  %v1141_v59 = vsel %vm709_vm0, %v1109_v46, 0  ;;  %2416 = vset.pattern.permute.xlu1 %v2915_v43  ;;  %1095 = vst.msk [vmem:[#allocation7] sm:$0xff] %vm709_vm0, %v2916_v44  ;;  %v3546_v45 = vld [vmem:[#allocation5 + $0x10] sm:$0xff] }
 0x26b   : > { %2196 = vmatpush3.bf16.xpose.msra.mxu1 %v1138_v47  ;;  %v1064_v49 = vadd.f32 %v2191_v48, %v2063_v32  ;;  %v1055_v50 = vpop.f32.mrb[13].mxu0  ;;  %1089 = vst.msk [vmem:[#allocation6 + $0x10] sm:$0xff] %vm1078_vm1, %v2916_v44  ;;  %1087 = vst.msk [vmem:[#allocation6] sm:$0xff] %vm1078_vm1, %v2916_v44 }
 0x26c   : > { %2251 = vmatprep.subr.msk.bf16.mxu1 %vm709_vm0, %v1109_v46  ;;  %v1056_v51 = vadd.f32 %v2063_v32, %v1055_v50  ;;  %v2192_v52 = vpop.f32.mrb[14].mxu0  ;;  %2212 = vmatpush3.bf16.msra.mxu0 %v1114_v23  ;;  %1088 = vst.msk [vmem:[#allocation6 + $0x8] sm:$0xff] %vm1078_vm1, %v2916_v44  ;;  %1090 = vst.msk [vmem:[#allocation6 + $0x18] sm:$0xff] %vm1078_vm1, %v2916_v44  ;;  %v3548_v46 = vld [vmem:[#allocation5] sm:$0xff]  ;;  %v3593_v2 = vld [vmem:[#allocation5 + $0x30] sm:$0xff] }
 0x26d   : > { %v1067_v53 = vadd.f32 %v2192_v52, %v2063_v32  ;;  %v1058_v54 = vpop.f32.mrb[15].mxu0  ;;  %v1116_v25 = vld [vmem:[#allocation4 + $0x18] sm:$0xff]  ;;  %1091 = vst.msk [vmem:[#allocation6 + $0x20] sm:$0xff] %vm1078_vm1, %v2916_v44  ;;  %1092 = vst.msk [vmem:[#allocation6 + $0x28] sm:$0xff] %vm1078_vm1, %v2916_v44 }
 0x26e   : > { %v1059_v55 = vadd.f32 %v2063_v32, %v1058_v54  ;;  %v1115_v24 = vld [vmem:[#allocation4 + $0x10] sm:$0xff]  ;;  %1093 = vst.msk [vmem:[#allocation6 + $0x30] sm:$0xff] %vm1078_vm1, %v2916_v44  ;;  %1094 = vst.msk [vmem:[#allocation6 + $0x38] sm:$0xff] %vm1078_vm1, %v2916_v44  ;;  %v3602_v6 = vld [vmem:[#allocation5 + $0x38] sm:$0xff] }
 0x26f   : > { %v1073_v56 = vpack.c.bf16 %v1067_v53, %v1064_v49  ;;  %2213 = vmatprep.subr.bf16.mxu0 %v1115_v24  ;;  %1096 = vst.msk [vmem:[#allocation7 + $0x8] sm:$0xff] %vm709_vm0, %v2916_v44  ;;  %1097 = vst.msk [vmem:[#allocation7 + $0x10] sm:$0xff] %vm709_vm0, %v2916_v44  ;;  %v3563_v53 = vld [vmem:[#allocation5 + $0x8] sm:$0xff] }
 0x270   : > { %v1072_v57 = vpack.c.bf16 %v1059_v55, %v1056_v51  ;;  %v1118_v63 = vld [vmem:[#allocation2 + $0x8] sm:$0xff]  ;;  %2214 = vmatpush3.bf16.msra.mxu0 %v1115_v24  ;;  %1098 = vst.msk [vmem:[#allocation7 + $0x18] sm:$0xff] %vm709_vm0, %v2916_v44  ;;  %1099 = vst.msk [vmem:[#allocation7 + $0x20] sm:$0xff] %vm709_vm0, %v2916_v44  ;;  %v3556_v51 = vld [vmem:[#allocation5 + $0x18] sm:$0xff] }
 0x271   : > { %1077 = vst.msk [vmem:[#allocation2 + $0x18] sm:$0xff] %vm709_vm0, %v1073_v56  ;;  %v1117_v58 = vld [vmem:[#allocation2] sm:$0xff]  ;;  %2215 = vmatprep.subr.bf16.mxu0 %v1116_v25  ;;  %1100 = vst.msk [vmem:[#allocation7 + $0x28] sm:$0xff] %vm709_vm0, %v2916_v44 }
 0x272   : > { %1076 = vst.msk [vmem:[#allocation2 + $0x10] sm:$0xff] %vm709_vm0, %v1072_v57  ;;  %2201 = vmatprep.mubr.msk.bf16.mxu1 %vm709_vm0, %v1117_v58  ;;  %1101 = vst.msk [vmem:[#allocation7 + $0x30] sm:$0xff] %vm709_vm0, %v2916_v44 }
 0x273   : > { %2198 = vmatpush3.bf16.xpose.msra.mxu1 %v1141_v59  ;;  %1102 = vst.msk [vmem:[#allocation7 + $0x38] sm:$0xff] %vm709_vm0, %v2916_v44 }
 0x274   : > { %2252 = vmatprep.subr.msk.bf16.mxu1 %vm709_vm0, %v1110_v60  ;;  %2216 = vmatpush3.bf16.msra.mxu0 %v1116_v25  ;;  %v3581_v60 = vld [vmem:[#allocation5 + $0x20] sm:$0xff] }
 0x278   : > { %v1120_v0 = vld [vmem:[#allocation2 + $0x18] sm:$0xff] }
 0x279   : > { %v1119_v62 = vld [vmem:[#allocation2 + $0x10] sm:$0xff] }
 0x27b   : > { %2200 = vmatpush3.bf16.xpose.msra.mxu1 %v1144_v61 }
 0x282   : > { %2202 = vmatmul.mubr.msk.bf16.vlgmr.msra.gmra.mrb[8].mxu1 %vm709_vm0, %v1118_v63  ;;  %v3587_v63 = vld [vmem:[#allocation5 + $0x28] sm:$0xff] }
 0x283   : > { %2205 = vmatprep.mubr.msk.bf16.mxu1 %vm709_vm0, %v1119_v62 }
 0x28a   : > { %2206 = vmatmul.mubr.msk.bf16.gmra.mrb[12].mxu1 %vm709_vm0, %v1120_v0 }
 0x355   : > { %v3498_v27 = vpop.f32.mrb[8].mxu1 }
 0x356   : > { %v3500_v28 = vpop.f32.mrb[9].mxu1  ;;  %v1225_v29 = vsel %vm709_vm0, %v3498_v27, -inf }
 0x357   : > { %1226 = vmax.xlane.f32.xlu1 %v1225_v29  ;;  %v3504_v30 = vpop.f32.mrb[10].mxu1  ;;  %v1219_v31 = vsel %vm709_vm0, %v3500_v28, -inf }
 0x358   : > { %1220 = vmax.xlane.f32.xlu0 %v1219_v31  ;;  %v3508_v32 = vpop.f32.mrb[11].mxu1  ;;  %v1228_v33 = vsel %vm709_vm0, %v3504_v30, -inf }
 0x359   : > { %v1222_v34 = vsel %vm709_vm0, %v3508_v32, -inf }
 0x35b   : > { %1229 = vmax.xlane.f32.xlu1 %v1228_v33 }
 0x35c   : > { %1223 = vmax.xlane.f32.xlu0 %v1222_v34 }
 0x35d   : > { %v3514_v35 = vpop.f32.mrb[12].mxu1 }
 0x35e   : > { %v3516_v36 = vpop.f32.mrb[13].mxu1  ;;  %v1237_v41 = vsel %vm709_vm0, %v3514_v35, -inf }
 0x35f   : > { %v3518_v37 = vpop.f32.mrb[14].mxu1  ;;  %v1231_v38 = vsel %vm709_vm0, %v3516_v36, -inf }
 0x360   : > { %1232 = vmax.xlane.f32.xlu0 %v1231_v38  ;;  %v3522_v39 = vpop.f32.mrb[15].mxu1  ;;  %v1240_v42 = vsel %vm709_vm0, %v3518_v37, -inf }
 0x361   : > { %v1234_v40 = vsel %vm709_vm0, %v3522_v39, -inf }
 0x362   : > { %1235 = vmax.xlane.f32.xlu1 %v1234_v40 }
 0x364   : > { %1238 = vmax.xlane.f32.xlu0 %v1237_v41 }
 0x366   : > { %1241 = vmax.xlane.f32.xlu1 %v1240_v42 }
 0x3e4   : > { %v1227_v47 = vpop.xlane.xlu1 %1226 }
 0x3e5   : > { %v3551_v48 = vmax.f32 %v3546_v45, %v1227_v47  ;;  %v1221_v49 = vpop.xlane.xlu0 %1220 }
 0x3e6   : > { %v3554_v50 = vmax.f32 %v3548_v46, %v1221_v49 }
 0x3e7   : > { %v1253_v52 = vsub.f32 %v3546_v45, %v3551_v48  ;;  %1551 = vst.msk [vmem:[#allocation5 + $0x10] sm:$0xff] %vm1078_vm1, %v3551_v48  ;;  %1287 = vperm.xlu1 %2416, %v3551_v48  }
 0x3e8   : > { %v1251_v54 = vsub.f32 %v3548_v46, %v3554_v50  ;;  %1549 = vst.msk [vmem:[#allocation5] sm:$0xff] %vm1078_vm1, %v3554_v50  ;;  %v1230_v55 = vpop.xlane.xlu1 %1229  ;;  %1277 = vperm.xlu0 %2415, %v3554_v50  }
 0x3e9   : > { %v3571_v56 = vmax.f32 %v3556_v51, %v1230_v55  ;;  %v1224_v57 = vpop.xlane.xlu0 %1223 }
 0x3ea   : > { %v3574_v58 = vmax.f32 %v3563_v53, %v1224_v57 }
 0x3eb   : > { %v1254_v59 = vsub.f32 %v3556_v51, %v3571_v56  ;;  %1552 = vst.msk [vmem:[#allocation5 + $0x18] sm:$0xff] %vm1078_vm1, %v3571_v56  ;;  %1292 = vperm.xlu1 %2416, %v3571_v56  }
 0x3ec   : > { %v1252_v61 = vsub.f32 %v3563_v53, %v3574_v58  ;;  %1550 = vst.msk [vmem:[#allocation5 + $0x8] sm:$0xff] %vm1078_vm1, %v3574_v58 }
 0x3ed   : > { %v1233_v62 = vpop.xlane.xlu0 %1232  ;;  %v1265_v46 = vmul.f32 1.442695, %v1254_v59 }
 0x3ee   : > { %v3590_v0 = vmax.f32 %v3581_v60, %v1233_v62 }
 0x3ef   : > { %1282 = vperm.xlu1 %2416, %v3574_v58   ;;  %v1236_v1 = vpop.xlane.xlu1 %1235 }
 0x3f0   : > { %v1255_v3 = vsub.f32 %v3581_v60, %v3590_v0  ;;  %1553 = vst.msk [vmem:[#allocation5 + $0x20] sm:$0xff] %vm1078_vm1, %v3590_v0  ;;  %v3600_v4 = vmax.f32 %v3587_v63, %v1236_v1  ;;  %v2429_v60 = vld [vmem:[#allocation23] sm:$0xff]  }
 0x3f1   : > { %v1239_v5 = vpop.xlane.xlu0 %1238  ;;  %2225 = vmatprep.subr.bf16.mxu0 %v2429_v60  ;;  %2241 = vmatprep.subr.bf16.mxu1 %v2429_v60 }
 0x3f2   : > { %v1256_v7 = vsub.f32 %v3587_v63, %v3600_v4  ;;  %1554 = vst.msk [vmem:[#allocation5 + $0x28] sm:$0xff] %vm1078_vm1, %v3600_v4  ;;  %v3609_v8 = vmax.f32 %v3593_v2, %v1239_v5  ;;  %2245 = vmatpush3.bf16.msra.mxu1 %v2429_v60  ;;  %v1339_v63 = vld [vmem:[#allocation6] sm:$0xff] }
 0x3f3   : > { %v1242_v9 = vpop.xlane.xlu1 %1241 }
 0x3f4   : > { %v1257_v12 = vsub.f32 %v3593_v2, %v3609_v8  ;;  %1555 = vst.msk [vmem:[#allocation5 + $0x30] sm:$0xff] %vm1078_vm1, %v3609_v8  ;;  %v3616_v10 = vmax.f32 %v3602_v6, %v1242_v9  ;;  %1307 = vperm.xlu1 %2416, %v3609_v8  }
 0x3f6   : > { %v1258_v11 = vsub.f32 %v3602_v6, %v3616_v10  ;;  %1556 = vst.msk [vmem:[#allocation5 + $0x38] sm:$0xff] %vm1078_vm1, %v3616_v10  ;;  %v1271_v50 = vmul.f32 1.442695, %v1257_v12 }
 0x3f8   : > { %1297 = vperm.xlu1 %2416, %v3590_v0   ;;  %v1273_v53 = vmul.f32 1.442695, %v1258_v11 }
 0x3fc   : > { %1302 = vperm.xlu1 %2416, %v3600_v4  }
 0x400   : > { %1312 = vperm.xlu1 %2416, %v3616_v10   ;;  %v1340_v10 = vld [vmem:[#allocation6 + $0x8] sm:$0xff] }
 0x466   : > { %v1288_v13 = vpop.permute.xlu1 %1287 }
 0x467   : > { %v1317_v14 = vsub.f32 %v3498_v27, %v1288_v13  ;;  %v1278_v15 = vpop.permute.xlu0 %1277 }
 0x468   : > { %v1315_v16 = vsub.f32 %v3500_v28, %v1278_v15 }
 0x469   : > { %v1327_v17 = vmul.f32 1.442695, %v1317_v14 }
 0x46a   : > { %v1323_v18 = vmul.f32 1.442695, %v1315_v16  ;;  %v1293_v19 = vpop.permute.xlu1 %1292 }
 0x46b   : > { %2433 = vpow2.f32 %v1327_v17  ;;  %v1318_v20 = vsub.f32 %v3504_v30, %v1293_v19  ;;  %v1261_v17 = vmul.f32 1.442695, %v1252_v61  ;;  %v1267_v19 = vmul.f32 1.442695, %v1255_v3  ;;  %v1341_v61 = vld [vmem:[#allocation6 + $0x10] sm:$0xff] }
 0x46c   : > { %2435 = vpow2.f32 %v1323_v18  ;;  %v1259_v18 = vmul.f32 1.442695, %v1251_v54 }
 0x46d   : > { %v1329_v21 = vmul.f32 1.442695, %v1318_v20  ;;  %v1269_v20 = vmul.f32 1.442695, %v1256_v7  ;;  %v1342_v7 = vld [vmem:[#allocation6 + $0x18] sm:$0xff] }
 0x46e   : > { %v1283_v22 = vpop.permute.xlu1 %1282 }
 0x46f   : > { %2437 = vpow2.f32 %v1329_v21  ;;  %v1316_v23 = vsub.f32 %v3508_v32, %v1283_v22  ;;  %v1263_v21 = vmul.f32 1.442695, %v1253_v52 }
 0x471   : > { %v1325_v24 = vmul.f32 1.442695, %v1316_v23 }
 0x473   : > { %2439 = vpow2.f32 %v1325_v24  ;;  %v1308_v25 = vpop.permute.xlu1 %1307 }
 0x474   : > { %v1321_v29 = vsub.f32 %v3514_v35, %v1308_v25 }
 0x475   : > { %v2434_v26 = vpop.eup %2433 }
 0x476   : > { %v2436_v27 = vpop.eup %2435  ;;  %v1361_v28 = vsel %vm709_vm0, %v2434_v26, 0.0  ;;  %v1335_v40 = vmul.f32 1.442695, %v1321_v29  ;;  %v1343_v29 = vld [vmem:[#allocation6 + $0x20] sm:$0xff] }
 0x477   : > { %1362 = vadd.xlane.f32.xlu0 %v1361_v28  ;;  %v1298_v31 = vpop.permute.xlu1 %1297  ;;  %v1355_v33 = vsel %vm709_vm0, %v2436_v27, 0.0 }
 0x478   : > { %v1319_v30 = vsub.f32 %v3516_v36, %v1298_v31  ;;  %1356 = vadd.xlane.f32.xlu1 %v1355_v33 }
 0x479   : > { %v2438_v34 = vpop.eup %2437 }
 0x47a   : > { %v1453_v38 = vpack.c.bf16 %v2438_v34, %v2434_v26  ;;  %v1331_v32 = vmul.f32 1.442695, %v1319_v30  ;;  %v1364_v41 = vsel %vm709_vm0, %v2438_v34, 0.0  ;;  %v1345_v30 = vld [vmem:[#allocation6 + $0x30] sm:$0xff]  ;;  %v1344_v34 = vld [vmem:[#allocation6 + $0x28] sm:$0xff] }
 0x47b   : > { %v1303_v42 = vpop.permute.xlu1 %1302 }
 0x47c   : > { %2441 = vpow2.f32 %v1331_v32  ;;  %v1320_v43 = vsub.f32 %v3522_v39, %v1303_v42  ;;  %1365 = vadd.xlane.f32.xlu1 %v1364_v41 }
 0x47d   : > { %v2440_v35 = vpop.eup %2439  ;;  %2443 = vpow2.f32 %v1335_v40 }
 0x47e   : > { %v1333_v44 = vmul.f32 1.442695, %v1320_v43  ;;  %v1358_v47 = vsel %vm709_vm0, %v2440_v35, 0.0  ;;  %v1452_v49 = vpack.c.bf16 %v2440_v35, %v2436_v27 }
 0x47f   : > { %1359 = vadd.xlane.f32.xlu0 %v1358_v47  ;;  %v1313_v36 = vpop.permute.xlu1 %1312 }
 0x480   : > { %2445 = vpow2.f32 %v1333_v44  ;;  %v1322_v55 = vsub.f32 %v3518_v37, %v1313_v36  ;;  %2217 = vmatprep.mubr.msk.bf16.mxu0 %vm709_vm0, %v1452_v49  ;;  %v1346_v44 = vld [vmem:[#allocation6 + $0x38] sm:$0xff] }
 0x481   : > { %2218 = vmatmul.mubr.msk.bf16.vlgmr.msra.gmra.mrb[16].mxu0 %vm709_vm0, %v1453_v38  ;;  %v2430_v36 = vld [vmem:[#allocation23 + $0x8] sm:$0xff]  }
 0x482   : > { %v1337_v57 = vmul.f32 1.442695, %v1322_v55  ;;  %2226 = vmatpush3.bf16.msra.mxu0 %v2429_v60  ;;  %2242 = vmatprep.subr.bf16.mxu1 %v2430_v36 }
 0x483   : > { %2227 = vmatprep.subr.bf16.mxu0 %v2430_v36  ;;  %2246 = vmatpush3.bf16.msra.mxu1 %v2430_v36 }
 0x484   : > { %2447 = vpow2.f32 %v1337_v57 }
 0x485   : > { %2449 = vpow2.f32 %v1261_v17 }
 0x486   : > { %v2442_v62 = vpop.eup %2441  ;;  %2451 = vpow2.f32 %v1259_v18  ;;  %2228 = vmatpush3.bf16.msra.mxu0 %v2430_v36 }
 0x487   : > { %v1367_v39 = vsel %vm709_vm0, %v2442_v62, 0.0  ;;  %v2444_v1 = vpop.eup %2443  ;;  %2453 = vpow2.f32 %v1267_v19 }
 0x488   : > { %1368 = vadd.xlane.f32.xlu0 %v1367_v39  ;;  %v1373_v9 = vsel %vm709_vm0, %v2444_v1, 0.0  ;;  %2455 = vpow2.f32 %v1269_v20 }
 0x489   : > { %2457 = vpow2.f32 %v1263_v21 }
 0x48a   : > { %v2446_v5 = vpop.eup %2445  ;;  %2459 = vpow2.f32 %v1265_v46 }
 0x48b   : > { %v1370_v13 = vsel %vm709_vm0, %v2446_v5, 0.0  ;;  %v1454_v14 = vpack.c.bf16 %v2446_v5, %v2442_v62  ;;  %2461 = vpow2.f32 %v1271_v50 }
 0x48c   : > { %1374 = vadd.xlane.f32.xlu0 %v1373_v9  ;;  %1371 = vadd.xlane.f32.xlu1 %v1370_v13  ;;  %2463 = vpow2.f32 %v1273_v53  ;;  %v2431_v9 = vld [vmem:[#allocation23 + $0x10] sm:$0xff]  }
 0x48d   : > { %2221 = vmatprep.mubr.msk.bf16.mxu0 %vm709_vm0, %v1454_v14  ;;  %2229 = vmatprep.subr.bf16.mxu0 %v2431_v9 }
 0x48e   : > { %v2448_v37 = vpop.eup %2447  ;;  %2243 = vmatprep.subr.bf16.mxu1 %v2431_v9  ;;  %2230 = vmatpush3.bf16.msra.mxu0 %v2431_v9 }
 0x48f   : > { %v1376_v15 = vsel %vm709_vm0, %v2448_v37, 0.0  ;;  %v1455_v16 = vpack.c.bf16 %v2448_v37, %v2444_v1  ;;  %v2450_v54 = vpop.eup %2449  ;;  %2247 = vmatpush3.bf16.msra.mxu1 %v2431_v9 }
 0x490   : > { %1377 = vadd.xlane.f32.xlu1 %v1376_v15  ;;  %v2452_v58 = vpop.eup %2451  ;;  %v1348_v23 = vmul.f32 %v2450_v54, %v1340_v10  ;;  %v2432_v15 = vld [vmem:[#allocation23 + $0x18] sm:$0xff]  }
 0x491   : > { %2222 = vmatmul.mubr.msk.bf16.gmra.mrb[20].mxu0 %vm709_vm0, %v1455_v16  ;;  %v2454_v45 = vpop.eup %2453  ;;  %v1347_v3 = vmul.f32 %v2452_v58, %v1339_v63  ;;  %2231 = vmatprep.subr.bf16.mxu0 %v2432_v15 }
 0x492   : > { %v2456_v48 = vpop.eup %2455  ;;  %v1351_v31 = vmul.f32 %v2454_v45, %v1343_v29  ;;  %2244 = vmatprep.subr.bf16.mxu1 %v2432_v15  ;;  %2232 = vmatpush3.bf16.msra.mxu0 %v2432_v15 }
 0x493   : > { %v2458_v51 = vpop.eup %2457  ;;  %v1352_v41 = vmul.f32 %v2456_v48, %v1344_v34  ;;  %2248 = vmatpush3.bf16.msra.mxu1 %v2432_v15 }
 0x494   : > { %v2460_v52 = vpop.eup %2459  ;;  %v1349_v0 = vmul.f32 %v2458_v51, %v1341_v61 }
 0x495   : > { %v2462_v56 = vpop.eup %2461  ;;  %v1350_v12 = vmul.f32 %v2460_v52, %v1342_v7 }
 0x496   : > { %v2464_v59 = vpop.eup %2463  ;;  %v1353_v32 = vmul.f32 %v2462_v56, %v1345_v30 }
 0x497   : > { %v1354_v55 = vmul.f32 %v2464_v59, %v1346_v44 }
 0x4a1   : > { %1411 = vperm.xlu1 %2416, %v2450_v54   ;;  %v1398_v54 = vld [vmem:[#allocation7 + $0x10] sm:$0xff] }
 0x4a2   : > { %1406 = vperm.xlu0 %2415, %v2452_v58  }
 0x4a5   : > { %1426 = vperm.xlu1 %2416, %v2454_v45   ;;  %v1396_v45 = vld [vmem:[#allocation7] sm:$0xff] }
 0x4a6   : > { %1431 = vperm.xlu0 %2415, %v2456_v48   ;;  %v1399_v48 = vld [vmem:[#allocation7 + $0x18] sm:$0xff] }
 0x4a9   : > { %1416 = vperm.xlu1 %2416, %v2458_v51  }
 0x4aa   : > { %1421 = vperm.xlu0 %2415, %v2460_v52   ;;  %v1397_v52 = vld [vmem:[#allocation7 + $0x8] sm:$0xff] }
 0x4ad   : > { %1436 = vperm.xlu1 %2416, %v2462_v56  }
 0x4ae   : > { %1441 = vperm.xlu0 %2415, %v2464_v59  }
 0x504   : > { %v1363_v2 = vpop.xlane.xlu0 %1362 }
 0x505   : > { %v1381_v4 = vadd.f32 %v1363_v2, %v1349_v0  ;;  %v1357_v6 = vpop.xlane.xlu1 %1356 }
 0x506   : > { %v1379_v8 = vadd.f32 %v1357_v6, %v1347_v3 }
 0x507   : > { %1390 = vst.msk [vmem:[#allocation6 + $0x10] sm:$0xff] %vm1078_vm1, %v1381_v4 }
 0x508   : > { %1388 = vst.msk [vmem:[#allocation6] sm:$0xff] %vm1078_vm1, %v1379_v8 }
 0x509   : > { %v1366_v11 = vpop.xlane.xlu1 %1365 }
 0x50a   : > { %v1382_v22 = vadd.f32 %v1366_v11, %v1350_v12  ;;  %v1402_v12 = vld [vmem:[#allocation7 + $0x30] sm:$0xff]  ;;  %v1400_v11 = vld [vmem:[#allocation7 + $0x20] sm:$0xff] }
 0x50c   : > { %1391 = vst.msk [vmem:[#allocation6 + $0x18] sm:$0xff] %vm1078_vm1, %v1382_v22  ;;  %v1360_v24 = vpop.xlane.xlu0 %1359  ;;  %v1403_v22 = vld [vmem:[#allocation7 + $0x38] sm:$0xff] }
 0x50d   : > { %v1380_v25 = vadd.f32 %v1360_v24, %v1348_v23  ;;  %v1401_v24 = vld [vmem:[#allocation7 + $0x28] sm:$0xff] }
 0x50e   : > { %v1570_v26 = vld [vmem:[#allocation6 + $0x10] sm:$0xff] }
 0x50f   : > { %1389 = vst.msk [vmem:[#allocation6 + $0x8] sm:$0xff] %vm1078_vm1, %v1380_v25  ;;  %2465 = vrcp.f32 %v1570_v26  ;;  %v1568_v27 = vld [vmem:[#allocation6] sm:$0xff] }
 0x510   : > { %2467 = vrcp.f32 %v1568_v27 }
 0x513   : > { %v1571_v28 = vld [vmem:[#allocation6 + $0x18] sm:$0xff] }
 0x514   : > { %2469 = vrcp.f32 %v1571_v28 }
 0x515   : > { %v1369_v33 = vpop.xlane.xlu0 %1368 }
 0x516   : > { %v1383_v38 = vadd.f32 %v1369_v33, %v1351_v31  ;;  %v1569_v40 = vld [vmem:[#allocation6 + $0x8] sm:$0xff] }
 0x517   : > { %2471 = vrcp.f32 %v1569_v40 }
 0x518   : > { %1392 = vst.msk [vmem:[#allocation6 + $0x20] sm:$0xff] %vm1078_vm1, %v1383_v38 }
 0x519   : > { %v2466_v42 = vpop.eup %2465  ;;  %v1375_v43 = vpop.xlane.xlu0 %1374 }
 0x51a   : > { %v1372_v35 = vpop.xlane.xlu1 %1371  ;;  %v1385_v47 = vadd.f32 %v1375_v43, %v1353_v32  ;;  %1596 = vperm.xlu1 %2416, %v2466_v42   ;;  %v2468_v57 = vpop.eup %2467 }
 0x51b   : > { %v1384_v49 = vadd.f32 %v1372_v35, %v1352_v41 }
 0x51c   : > { %1394 = vst.msk [vmem:[#allocation6 + $0x30] sm:$0xff] %vm1078_vm1, %v1385_v47 }
 0x51d   : > { %1393 = vst.msk [vmem:[#allocation6 + $0x28] sm:$0xff] %vm1078_vm1, %v1384_v49 }
 0x51e   : > { %v1378_v62 = vpop.xlane.xlu1 %1377  ;;  %v2470_v39 = vpop.eup %2469  ;;  %1586 = vperm.xlu1 %2416, %v2468_v57  }
 0x51f   : > { %v1386_v1 = vadd.f32 %v1378_v62, %v1354_v55  ;;  %1601 = vperm.xlu0 %2415, %v2470_v39   ;;  %v1572_v5 = vld [vmem:[#allocation6 + $0x20] sm:$0xff] }
 0x520   : > { %2473 = vrcp.f32 %v1572_v5 }
 0x521   : > { %1395 = vst.msk [vmem:[#allocation6 + $0x38] sm:$0xff] %vm1078_vm1, %v1386_v1  ;;  %v2472_v13 = vpop.eup %2471  ;;  %v1407_v46 = vpop.permute.xlu0 %1406 }
 0x522   : > { %v1412_v21 = vpop.permute.xlu1 %1411  ;;  %v1444_v59 = vmul.f32 %v1407_v46, %v1396_v45  ;;  %v1754_v45 = vld [vmem:[%s3367_s1 + $0x10] sm:$0xff] }
 0x523   : > { %1591 = vperm.xlu0 %2415, %v2472_v13   ;;  %v1574_v14 = vld [vmem:[#allocation6 + $0x30] sm:$0xff]  ;;  %v1445_v2 = vmul.f32 %v1412_v21, %v1397_v52  ;;  %v1752_v52 = vld [vmem:[%s3367_s1] sm:$0xff] }
 0x524   : > { %v1573_v37 = vld [vmem:[#allocation6 + $0x28] sm:$0xff]  ;;  %2475 = vrcp.f32 %v1574_v14 }
 0x525   : > { %2477 = vrcp.f32 %v1573_v37  ;;  %v1432_v53 = vpop.permute.xlu0 %1431 }
 0x526   : > { %v1427_v50 = vpop.permute.xlu1 %1426  ;;  %v1449_v33 = vmul.f32 %v1432_v53, %v1401_v24 }
 0x527   : > { %v1448_v26 = vmul.f32 %v1427_v50, %v1400_v11 }
 0x528   : > { %v1575_v16 = vld [vmem:[#allocation6 + $0x38] sm:$0xff] }
 0x529   : > { %2479 = vrcp.f32 %v1575_v16  ;;  %v1422_v51 = vpop.permute.xlu0 %1421 }
 0x52a   : > { %v2474_v17 = vpop.eup %2473  ;;  %v1417_v58 = vpop.permute.xlu1 %1416  ;;  %v1447_v61 = vmul.f32 %v1422_v51, %v1399_v48 }
 0x52b   : > { %1606 = vperm.xlu1 %2416, %v2474_v17   ;;  %v1446_v56 = vmul.f32 %v1417_v58, %v1398_v54  ;;  %v2080_v54 = vld [vmem:[#allocation25] ss:$0 sm:$0xff] }
 0x52d   : > { %v1442_v23 = vpop.permute.xlu0 %1441 }
 0x52e   : > { %v2476_v18 = vpop.eup %2475  ;;  %v1437_v10 = vpop.permute.xlu1 %1436  ;;  %v1451_v29 = vmul.f32 %v1442_v23, %v1403_v22  ;;  %v1756_v22 = vld [vmem:[%s3367_s1 + $0x20] sm:$0xff] }
 0x52f   : > { %v2478_v19 = vpop.eup %2477  ;;  %1616 = vperm.xlu1 %2416, %v2476_v18   ;;  %v1450_v25 = vmul.f32 %v1437_v10, %v1402_v12  ;;  %v1758_v12 = vld [vmem:[%s3367_s1 + $0x30] sm:$0xff] }
 0x530   : > { %1611 = vperm.xlu0 %2415, %v2478_v19  }
 0x533   : > { %v2480_v20 = vpop.eup %2479 }
 0x534   : > { %1621 = vperm.xlu0 %2415, %v2480_v20  }
 0x554   : > { %v2219_v60 = vpop.f32.mrb[16].mxu0 }
 0x555   : > { %v1535_v63 = vadd.f32 %v2219_v60, %v1446_v56  ;;  %v1502_v0 = vpop.f32.mrb[17].mxu0  ;;  %v1755_v60 = vld [vmem:[%s3367_s1 + $0x18] sm:$0xff] }
 0x556   : > { %v1533_v3 = vadd.f32 %v1502_v0, %v1444_v59  ;;  %v2220_v4 = vpop.f32.mrb[18].mxu0 }
 0x557   : > { %1543 = vst.msk [vmem:[#allocation7 + $0x10] sm:$0xff] %vm709_vm0, %v1535_v63  ;;  %v1536_v6 = vadd.f32 %v2220_v4, %v1447_v61  ;;  %v1505_v7 = vpop.f32.mrb[19].mxu0 }
 0x558   : > { %1541 = vst.msk [vmem:[#allocation7] sm:$0xff] %vm709_vm0, %v1533_v3  ;;  %v1534_v8 = vadd.f32 %v1505_v7, %v1445_v2  ;;  %v1753_v2 = vld [vmem:[%s3367_s1 + $0x8] sm:$0xff] }
 0x559   : > { %1544 = vst.msk [vmem:[#allocation7 + $0x18] sm:$0xff] %vm709_vm0, %v1536_v6 }
 0x55a   : > { %1542 = vst.msk [vmem:[#allocation7 + $0x8] sm:$0xff] %vm709_vm0, %v1534_v8 }
 0x55e   : > { %v1562_v55 = vld [vmem:[#allocation7 + $0x10] sm:$0xff] }
 0x55f   : > { %v1560_v44 = vld [vmem:[#allocation7] sm:$0xff] }
 0x560   : > { %v1563_v35 = vld [vmem:[#allocation7 + $0x18] sm:$0xff] }
 0x561   : > { %v1561_v36 = vld [vmem:[#allocation7 + $0x8] sm:$0xff] }
 0x564   : > { %v2223_v27 = vpop.f32.mrb[20].mxu0 }
 0x565   : > { %v1539_v28 = vadd.f32 %v2223_v27, %v1450_v25  ;;  %v1518_v31 = vpop.f32.mrb[21].mxu0  ;;  %v1759_v25 = vld [vmem:[%s3367_s1 + $0x38] sm:$0xff] }
 0x566   : > { %v1537_v30 = vadd.f32 %v1518_v31, %v1448_v26  ;;  %v2224_v34 = vpop.f32.mrb[22].mxu0 }
 0x567   : > { %1547 = vst.msk [vmem:[#allocation7 + $0x30] sm:$0xff] %vm709_vm0, %v1539_v28  ;;  %v1540_v38 = vadd.f32 %v2224_v34, %v1451_v29  ;;  %v1521_v40 = vpop.f32.mrb[23].mxu0  ;;  %v1757_v28 = vld [vmem:[%s3367_s1 + $0x28] sm:$0xff] }
 0x568   : > { %1545 = vst.msk [vmem:[#allocation7 + $0x20] sm:$0xff] %vm709_vm0, %v1537_v30  ;;  %v1538_v32 = vadd.f32 %v1521_v40, %v1449_v33 }
 0x569   : > { %1548 = vst.msk [vmem:[#allocation7 + $0x38] sm:$0xff] %vm709_vm0, %v1540_v38 }
 0x56a   : > { %1546 = vst.msk [vmem:[#allocation7 + $0x28] sm:$0xff] %vm709_vm0, %v1538_v32 }
 0x56e   : > { %v1566_v19 = vld [vmem:[#allocation7 + $0x30] sm:$0xff] }
 0x56f   : > { %v1564_v13 = vld [vmem:[#allocation7 + $0x20] sm:$0xff] }
 0x570   : > { %v1567_v20 = vld [vmem:[#allocation7 + $0x38] sm:$0xff] }
 0x571   : > { %v1565_v14 = vld [vmem:[#allocation7 + $0x28] sm:$0xff] }
 0x599   : > { %v1597_v41 = vpop.permute.xlu1 %1596 }
 0x59a   : > { %v1626_v39 = vmul.f32 %v1597_v41, %v1562_v55 }
 0x59d   : > { %v1587_v43 = vpop.permute.xlu1 %1586 }
 0x59e   : > { %v1602_v42 = vpop.permute.xlu0 %1601  ;;  %v1624_v57 = vmul.f32 %v1587_v43, %v1560_v44 }
 0x59f   : > { %v1627_v47 = vmul.f32 %v1602_v42, %v1563_v35 }
 0x5a1   : > { %v1633_v5 = vpack.c.bf16 %v1627_v47, %v1626_v39 }
 0x5a2   : > { %v1592_v49 = vpop.permute.xlu0 %1591 }
 0x5a3   : > { %v1625_v62 = vmul.f32 %v1592_v49, %v1561_v36 }
 0x5a5   : > { %v1632_v1 = vpack.c.bf16 %v1625_v62, %v1624_v57 }
 0x5a7   : > { %2233 = vmatprep.mubr.msk.bf16.mxu0 %vm709_vm0, %v1632_v1 }
 0x5a8   : > { %2234 = vmatmul.mubr.msk.bf16.vlgmr.msra.gmra.mrb[24].mxu0 %vm709_vm0, %v1633_v5 }
 0x5aa   : > { %v1607_v9 = vpop.permute.xlu1 %1606 }
 0x5ab   : > { %v1628_v15 = vmul.f32 %v1607_v9, %v1564_v13 }
 0x5ae   : > { %v1617_v17 = vpop.permute.xlu1 %1616 }
 0x5af   : > { %v1612_v37 = vpop.permute.xlu0 %1611  ;;  %v1630_v46 = vmul.f32 %v1617_v17, %v1566_v19 }
 0x5b0   : > { %v1629_v16 = vmul.f32 %v1612_v37, %v1565_v14 }
 0x5b2   : > { %v1634_v18 = vpack.c.bf16 %v1629_v16, %v1628_v15 }
 0x5b3   : > { %v1622_v21 = vpop.permute.xlu0 %1621 }
 0x5b4   : > { %v1631_v50 = vmul.f32 %v1622_v21, %v1567_v20  ;;  %2237 = vmatprep.mubr.msk.bf16.mxu1 %vm709_vm0, %v1634_v18 }
 0x5b6   : > { %v1635_v53 = vpack.c.bf16 %v1631_v50, %v1630_v46 }
 0x5b8   : > { %2238 = vmatmul.mubr.msk.bf16.vlgmr.msra.gmra.mrb[16].mxu1 %vm709_vm0, %v1635_v53 }
 0x67b   : > { %v2235_v58 = vpop.f32.mrb[24].mxu0 }
 0x67c   : > { %v1730_v48 = vadd.f32 %v2235_v58, %v2080_v54  ;;  %v1721_v51 = vpop.f32.mrb[25].mxu0 }
 0x67d   : > { %v1722_v56 = vadd.f32 %v2080_v54, %v1721_v51  ;;  %v2236_v59 = vpop.f32.mrb[26].mxu0 }
 0x67e   : > { %v1762_v61 = vadd.f32 %v1754_v45, %v1730_v48  ;;  %v1733_v63 = vadd.f32 %v2236_v59, %v2080_v54  ;;  %v1724_v0 = vpop.f32.mrb[27].mxu0 }
 0x67f   : > { %v1760_v3 = vadd.f32 %v1752_v52, %v1722_v56  ;;  %v1725_v4 = vadd.f32 %v2080_v54, %v1724_v0 }
 0x680   : > { %1770 = vst.msk [vmem:[%s621_s15 + $0x10] sm:$0xff] %vm709_vm0, %v1762_v61  ;;  %v1763_v6 = vadd.f32 %v1755_v60, %v1733_v63 }
 0x681   : > { %1768 = vst.msk [vmem:[%s621_s15] sm:$0xff] %vm709_vm0, %v1760_v3  ;;  %v1761_v7 = vadd.f32 %v1753_v2, %v1725_v4 }
 0x682   : > { %1771 = vst.msk [vmem:[%s621_s15 + $0x18] sm:$0xff] %vm709_vm0, %v1763_v6 }
 0x683   : > { %1769 = vst.msk [vmem:[%s621_s15 + $0x8] sm:$0xff] %vm709_vm0, %v1761_v7 }
 0x68b   : > { %v2239_v8 = vpop.f32.mrb[16].mxu1 }
 0x68c   : > { %v1746_v10 = vadd.f32 %v2239_v8, %v2080_v54  ;;  %v1737_v11 = vpop.f32.mrb[17].mxu1 }
 0x68d   : > { %v1738_v23 = vadd.f32 %v2080_v54, %v1737_v11  ;;  %v2240_v24 = vpop.f32.mrb[18].mxu1 }
 0x68e   : > { %v1766_v26 = vadd.f32 %v1758_v12, %v1746_v10  ;;  %v1749_v27 = vadd.f32 %v2240_v24, %v2080_v54  ;;  %v1740_v29 = vpop.f32.mrb[19].mxu1 }
 0x68f   : > { %v1764_v31 = vadd.f32 %v1756_v22, %v1738_v23  ;;  %v1741_v33 = vadd.f32 %v2080_v54, %v1740_v29 }
 0x690   : > { %1774 = vst.msk [vmem:[%s621_s15 + $0x30] sm:$0xff] %vm709_vm0, %v1766_v26  ;;  %v1767_v30 = vadd.f32 %v1759_v25, %v1749_v27 }
 0x691   : > { %1772 = vst.msk [vmem:[%s621_s15 + $0x20] sm:$0xff] %vm709_vm0, %v1764_v31  ;;  %v1765_v34 = vadd.f32 %v1757_v28, %v1741_v33 }
 0x692   : > { %1775 = vst.msk [vmem:[%s621_s15 + $0x38] sm:$0xff] %vm709_vm0, %v1767_v30 }
 0x693   : > { %1773 = vst.msk [vmem:[%s621_s15 + $0x28] sm:$0xff] %vm709_vm0, %v1765_v34 }
 0x694   : > { %2808 = shalt.err (!%p2805_p3)
}
 0x695   : > { %s2809_s4 = scalar_lea.hbm %s3708_s27, 1024  ;;  %s2813_s1 = scalar_lea.hbm %s3851_s26, 2048 }
 0x696   : > { %p2810_p13 = scmp.ne.s32.totalorder %s3708_s27, %s2809_s4  ;;  %p2814_p8 = scmp.lt.u32.totalorder %s3708_s27, %s3851_s26 }
 0x697   : > { %p2815_p12 = scmp.lt.u32.totalorder %s2813_s1, %s2809_s4  ;;  %p2817_p10 = scmp.lt.u32.totalorder %s2809_s4, %s3708_s27 }
 0x698   : > { %p2811_p2 = pnand %p2810_p13, %p3852_p11 }
 0x699   : > { %p2816_p9 = por %p2815_p12, %p2814_p8 }
 0x69a   : > { %p2812_p4 = pneg %p2811_p2 }
 0x69b   : > { %p2818_p1 = por %p2817_p10, %p2816_p9 }
 0x69d   : > { %p2819_p5 = pnand %p2818_p1, %p2812_p4 }
 0x69f   : > { %2822 = shalt.err (!%p2819_p5)
}
 0x6a0   : > { %s2918_s0 = smov 128   ;;  %s2919_s30 = smov 8  }
 0x6a1   : > { %2291 = dma.vmem_to_hbm [thread:$0]  (%p3852_p11), %s3710_s28, 1024, %s3708_s27, %s1777_s7, %s2918_s0, %s2918_s0, %s2919_s30  }
 0x6a2 PF: > { %s3853_s22 = sld [smem:[#allocation40_spill]]  ;;  %s3854_s23 = sld [smem:[#allocation36_spill]] }
 0x6a3   : > { %s1807_s15 = sand.u32 1, %s2877_s17  }
 0x6a4   : > { %s1808_s19 = scalar_lea.sflag [#allocation10], %s1807_s15 }
 0x6a8   : > { %p3855_p0 = scmp.ne.s32.totalorder %s3853_s22, 0  ;;  %p3856_p6 = scmp.ge.s32.totalorder %s3854_s23, 2 }
 0x6aa   : > { %p2329_p7 = pnand %p3856_p6, %p3855_p0 }
 0x6ac   : > { %2872 = dma.done.wait (!%p2329_p7), %s1808_s19, 1024  }
 0x6ad   : > { %2874 = vsyncadd (!%p2329_p7), %s1808_s19, 4294966272  ;;  %s34_s22 = sadd.s32 1, %s3854_s23   ;;  %s3857_s24 = sld [smem:[#allocation34_spill]] }
 0x6ae   : > { %p31_p3 = scmp.ge.s32.totalorder %s34_s22, 4   ;;  %s3858_s19 = sld [smem:[#allocation39_spill]] }
 0x6af   : > { %s3859_s9 = sld [smem:[#allocation38_spill]]  ;;  %s3860_s17 = smov %s2881_s18 }
 0x6b0   : > { %s3862_s20 = smov %s2893_s21  ;;  %33 = sbr.rel (!%p31_p3) target bundleno = 22 (0x16), region = 181 }
 0x6b3   : > { %s3861_s18 = smov %s3857_s24 }
 0x6b5   : > { %s3863_s21 = smov %s3859_s9 }
 0x6b7   :  { %1813 = vsyncpa [#allocation9], 1 }
 0x6b8   :  { %1815 = vsyncpa [#allocation9 + $0x1], 1 }
 0x6b9   :  { %1816 = vsyncpa [#allocation12], 1 }
 0x6ba   :  { %1818 = vsyncpa [#allocation12 + $0x1], 1 }
 0x6bb   :  { %1819 = vsyncpa [#allocation15], 1 }
 0x6bc   :  { %1820 = vsyncpa [#allocation18], 1 }
 0x6bd   :  { %1821 = vsyncpa [#allocation21], 1 }
 0x6be   :  { %1822 = vsyncpa [#allocation24], 1 }
 0x6bf   :  { %1823 = vsyncpa [#allocation10], 1 }
 0x6c0   :  { %1825 = vsyncpa [#allocation10 + $0x1], 1 }

</bundles_post_ra>
